<compile_context>
chip_gen: v6e
topology: v6e:2x2x1
jax: 0.10.0
libtpu: 0.0.40
codegen_flags: <defaults>
</compile_context>

<pallas_src>
import jax
import jax.numpy as jnp
import numpy as np
from jax.experimental import pallas as pl
from jax.experimental.pallas import tpu as pltpu


def _bahdanau_kernel(len_ref,     # scalar prefetch: (B,) int32 in SMEM
                     q_ref,       # (Bb, T, H)   query block
                     e_ref,       # (Bb, Sb, H)  encoder block
                     wq_cat_ref,  # (H, 2H) = [W_s.T | W_out_query.T]
                     wh_t_ref,    # (H, H)  = W_h.T
                     v_ref,       # (1, H)
                     woc_t_ref,   # (H, H)  = W_out_context.T
                     out_ref,     # (Bb, T, H)
                     qws_sc,      # (Bb, T, H)  f32: W_s(query)
                     qwo_sc,      # (Bb*T, H)   f32: query @ W_out_query.T
                     m_sc,        # (Bb, T, 1)  f32: running max
                     l_sc,        # (Bb, T, 1)  f32: running sum
                     acc_sc):     # (Bb, T, H)  f32: context accumulator
    Bb, T, H = q_ref.shape
    Sb = e_ref.shape[1]
    ks = pl.program_id(1)
    w_dt = wh_t_ref.dtype

    @pl.when(ks == 0)
    def _init():
        # Fused query-side projection: one wide (Bb*T, H) @ (H, 2H) matmul.
        q_flat = q_ref[...].reshape(Bb * T, H).astype(w_dt)
        qcat = jnp.dot(q_flat, wq_cat_ref[...],
                       preferred_element_type=jnp.float32)          # (Bb*T, 2H)
        qws_sc[...] = qcat[:, :H].reshape(Bb, T, H)
        qwo_sc[...] = qcat[:, H:]
        m_sc[...] = jnp.full_like(m_sc, -1e30)
        l_sc[...] = jnp.zeros_like(l_sc)
        acc_sc[...] = jnp.zeros_like(acc_sc)

    # Encoder projection for this source block: (Bb*Sb, H) @ (H, H) on the MXU.
    e_blk = e_ref[...]                                               # (Bb, Sb, H)
    eW = jnp.dot(e_blk.reshape(Bb * Sb, H).astype(w_dt), wh_t_ref[...],
                 preferred_element_type=jnp.float32).reshape(Bb, Sb, H)

    # score[b, t, s] = sum_h v[h] * tanh(qW[b,t,h] + eW[b,s,h])
    # VPU multiply + lane reduce (avoids an N=1 MXU matmul).
    feat = jnp.tanh(qws_sc[...][:, :, None, :] + eW[:, None, :, :])  # (Bb,T,Sb,H)
    v_row = v_ref[...].astype(jnp.float32).reshape(1, 1, 1, H)
    score = jnp.sum(feat * v_row, axis=-1)                           # (Bb, T, Sb)

    # Mask padded source positions with a large finite negative (never NaN).
    b0 = pl.program_id(0) * Bb
    s_idx = ks * Sb + jax.lax.broadcasted_iota(jnp.int32, (T, Sb), 1)
    penalty = jnp.stack(
        [jnp.where(s_idx < len_ref[b0 + jb], 0.0, -1e30) for jb in range(Bb)],
        axis=0)                                                      # (Bb, T, Sb)
    score = score + penalty

    # Online softmax update over the source axis.
    m_old = m_sc[...]
    m_new = jnp.maximum(m_old, jnp.max(score, axis=-1, keepdims=True))
    alpha = jnp.exp(m_old - m_new)
    p = jnp.exp(score - m_new)                                       # (Bb, T, Sb)
    l_sc[...] = alpha * l_sc[...] + jnp.sum(p, axis=-1, keepdims=True)
    acc_sc[...] = alpha * acc_sc[...] + jnp.einsum(
        "bts,bsh->bth", p.astype(e_blk.dtype), e_blk,
        preferred_element_type=jnp.float32)
    m_sc[...] = m_new

    @pl.when(ks == pl.num_programs(1) - 1)
    def _finalize():
        inv_l = pl.reciprocal(l_sc[...], approx=True)                # (Bb, T, 1)
        context = (acc_sc[...] * inv_l).reshape(Bb * T, H)
        out = jnp.tanh(
            jnp.dot(context.astype(w_dt), woc_t_ref[...],
                    preferred_element_type=jnp.float32)
            + qwo_sc[...])
        out_ref[...] = out.reshape(Bb, T, H).astype(out_ref.dtype)


def bahdanau_attention(query, encoder_outputs, src_lengths,
                       W_h, W_s, v, W_out,
                       *, block_b=None, block_s=None, mxu_dtype=None):
    """query (B,T,H), encoder_outputs (B,S,H), src_lengths (B,).
    W_h, W_s: (H,H); v: (1,H); W_out: (H,2H) -- PyTorch Linear (out,in) layout.
    mxu_dtype: optionally cast matmul operands (e.g. jnp.bfloat16 on v6e/v7x),
    accumulation stays f32."""
    B, T, H = query.shape
    _, S, _ = encoder_outputs.shape

    if block_b is None:
        block_b = min(B, max(1, pl.cdiv(128, T)))   # aim for >=128 matmul rows
    if block_s is None:
        block_s = min(S, 128)                       # bounds the (Bb,T,Sb,H) tile
    assert B % block_b == 0, "B must be divisible by block_b"
    assert S % block_s == 0, "S must be divisible by block_s"
    assert block_s == S or block_s % 8 == 0

    w_dt = mxu_dtype if mxu_dtype is not None else query.dtype
    # Pre-fuse / pre-split weights in the wrapper (no in-kernel weight slicing):
    #   wq_cat = [W_s.T | W_out_query.T]  -> single wide query-side matmul
    #   woc_t  = W_out_context.T          -> finalize matmul
    wq_cat = jnp.concatenate([W_s.T, W_out[:, H:].T], axis=1).astype(w_dt)  # (H, 2H)
    wh_t = W_h.T.astype(w_dt)                                               # (H, H)
    woc_t = W_out[:, :H].T.astype(w_dt)                                     # (H, H)

    grid_spec = pltpu.PrefetchScalarGridSpec(
        num_scalar_prefetch=1,
        grid=(B // block_b, S // block_s),
        in_specs=[
            pl.BlockSpec((block_b, T, H), lambda b, s, lens: (b, 0, 0)),
            pl.BlockSpec((block_b, block_s, H), lambda b, s, lens: (b, s, 0)),
            pl.BlockSpec((H, 2 * H), lambda b, s, lens: (0, 0)),
            pl.BlockSpec((H, H), lambda b, s, lens: (0, 0)),
            pl.BlockSpec((1, H), lambda b, s, lens: (0, 0)),
            pl.BlockSpec((H, H), lambda b, s, lens: (0, 0)),
        ],
        out_specs=pl.BlockSpec((block_b, T, H), lambda b, s, lens: (b, 0, 0)),
        scratch_shapes=[
            pltpu.VMEM((block_b, T, H), jnp.float32),    # W_s(query)
            pltpu.VMEM((block_b * T, H), jnp.float32),   # query @ W_out_q.T
            pltpu.VMEM((block_b, T, 1), jnp.float32),    # running max
            pltpu.VMEM((block_b, T, 1), jnp.float32),    # running sum
            pltpu.VMEM((block_b, T, H), jnp.float32),    # context accumulator
        ],
    )

    return pl.pallas_call(
        _bahdanau_kernel,
        out_shape=jax.ShapeDtypeStruct((B, T, H), query.dtype),
        grid_spec=grid_spec,
        compiler_params=pltpu.CompilerParams(
            dimension_semantics=("parallel", "arbitrary"),
            vmem_limit_bytes=48 * 1024 * 1024),
    )(src_lengths.astype(jnp.int32), query, encoder_outputs,
      wq_cat, wh_t, v, woc_t)


def _reference(query, encoder_outputs, src_lengths, W_h, W_s, v, W_out):
    """Pure-JAX re-implementation of the PyTorch forward for validation."""
    S = encoder_outputs.shape[1]
    qW = query @ W_s.T                                  # (B, T, H)
    eW = encoder_outputs @ W_h.T                        # (B, S, H)
    feat = jnp.tanh(qW[:, :, None, :] + eW[:, None, :, :])
    score = jnp.squeeze(feat @ v.T, -1)                 # (B, T, S)
    mask = (jnp.arange(S)[None, :] < src_lengths[:, None])[:, None, :]
    score = jnp.where(mask, score, -jnp.inf)
    align = jax.nn.softmax(score, axis=-1)
    context = align @ encoder_outputs                   # (B, T, H)
    return jnp.tanh(jnp.concatenate([context, query], -1) @ W_out.T)


if __name__ == "__main__":
    B, T, S, H = 2, 8, 16, 32
    key = jax.random.PRNGKey(0)
    k_q, k_e, k_wh, k_ws, k_v, k_wo = jax.random.split(key, 6)

    query = jax.random.normal(k_q, (B, T, H), dtype=jnp.float32)
    encoder_outputs = jax.random.normal(k_e, (B, S, H), dtype=jnp.float32)
    src_lengths = jnp.array([S, 5], dtype=jnp.int32)    # max length == S

    scale = 1.0 / np.sqrt(H)
    W_h = jax.random.uniform(k_wh, (H, H), jnp.float32, -scale, scale)
    W_s = jax.random.uniform(k_ws, (H, H), jnp.float32, -scale, scale)
    v = jax.random.uniform(k_v, (1, H), jnp.float32, -scale, scale)
    W_out = jax.random.uniform(k_wo, (H, 2 * H), jnp.float32,
                               -1.0 / np.sqrt(2 * H), 1.0 / np.sqrt(2 * H))

    # block_s=8 exercises the multi-block online-softmax reduction path;
    # on v6e/v7x pass mxu_dtype=jnp.bfloat16 for ~2x on the matmul stages.
    out = bahdanau_attention(query, encoder_outputs, src_lengths,
                             W_h, W_s, v, W_out, block_s=8)
    out = jax.block_until_ready(out)

    ref = _reference(query, encoder_outputs, src_lengths, W_h, W_s, v, W_out)
    np.testing.assert_allclose(np.asarray(out), np.asarray(ref),
                               rtol=2e-3, atol=2e-3)
    print("KERNEL_OK")
</pallas_src>

<mosaic_0001>
module attributes {stable_mosaic.version = 11 : i64} {
  func.func @_bahdanau_kernel(%arg0: i32, %arg1: i32, %arg2: memref<2xi32, #tpu.memory_space<smem>>, %arg3: memref<2x8x32xf32, #tpu.memory_space<vmem>>, %arg4: memref<2x8x32xf32, #tpu.memory_space<vmem>>, %arg5: memref<32x64xf32, #tpu.memory_space<vmem>>, %arg6: memref<32x32xf32, #tpu.memory_space<vmem>>, %arg7: memref<1x32xf32, #tpu.memory_space<vmem>>, %arg8: memref<32x32xf32, #tpu.memory_space<vmem>>, %arg9: memref<2x8x32xf32, #tpu.memory_space<vmem>>, %arg10: memref<2x8x32xf32, #tpu.memory_space<vmem>>, %arg11: memref<16x32xf32, #tpu.memory_space<vmem>>, %arg12: memref<2x8x1xf32, #tpu.memory_space<vmem>>, %arg13: memref<2x8x1xf32, #tpu.memory_space<vmem>>, %arg14: memref<2x8x32xf32, #tpu.memory_space<vmem>>) attributes {dimension_semantics = [#tpu.dimension_semantics<parallel>, #tpu.dimension_semantics<arbitrary>], iteration_bounds = array<i64: 1, 2>, scalar_prefetch = 1 : i64, scratch_operands = 5 : i64, tpu.core_type = #tpu.core_type<tc>, window_params = [{transform_indices = @transform_0, window_bounds = array<i64: 2, 8, 32>}, {transform_indices = @transform_1, window_bounds = array<i64: 2, 8, 32>}, {pipeline_mode = #tpu.pipeline_mode<synchronous>, transform_indices = @transform_2, window_bounds = array<i64: 32, 64>}, {pipeline_mode = #tpu.pipeline_mode<synchronous>, transform_indices = @transform_3, window_bounds = array<i64: 32, 32>}, {pipeline_mode = #tpu.pipeline_mode<synchronous>, transform_indices = @transform_4, window_bounds = array<i64: 1, 32>}, {pipeline_mode = #tpu.pipeline_mode<synchronous>, transform_indices = @transform_5, window_bounds = array<i64: 32, 32>}, {transform_indices = @transform_6, window_bounds = array<i64: 2, 8, 32>}]} {
    %c0_i32 = arith.constant 0 : i32
    %0 = arith.cmpi eq, %arg1, %c0_i32 : i32
    %1 = arith.extui %0 : i1 to i32
    %c0_i32_0 = arith.constant 0 : i32
    %2 = arith.cmpi ne, %1, %c0_i32_0 : i32
    scf.if %2 {
      %c0_39 = arith.constant 0 : index
      %c0_40 = arith.constant 0 : index
      %c0_41 = arith.constant 0 : index
      %70 = vector.load %arg3[%c0_39, %c0_40, %c0_41] : memref<2x8x32xf32, #tpu.memory_space<vmem>>, vector<2x8x32xf32>
      %71 = vector.shape_cast %70 : vector<2x8x32xf32> to vector<16x32xf32>
      %c0_42 = arith.constant 0 : index
      %c0_43 = arith.constant 0 : index
      %72 = vector.load %arg5[%c0_42, %c0_43] : memref<32x64xf32, #tpu.memory_space<vmem>>, vector<32x64xf32>
      %cst_44 = arith.constant dense<0.000000e+00> : vector<16x64xf32>
      %73 = tpu.matmul %71, %72, %cst_44 {dimension_numbers = #tpu.dot_dimension_numbers<[1], [0], [0], [1], [0, 0, 1, 1], [], []>} : vector<16x32xf32>, vector<32x64xf32>, vector<16x64xf32> -> vector<16x64xf32>
      %74 = vector.extract_strided_slice %73 {offsets = [0, 0], sizes = [16, 32], strides = [1, 1]} : vector<16x64xf32> to vector<16x32xf32>
      %75 = vector.shape_cast %74 : vector<16x32xf32> to vector<2x8x32xf32>
      %c0_45 = arith.constant 0 : index
      %c0_46 = arith.constant 0 : index
      %c0_47 = arith.constant 0 : index
      %76 = vector.load %arg10[%c0_45, %c0_46, %c0_47] : memref<2x8x32xf32, #tpu.memory_space<vmem>>, vector<2x8x32xf32>
      tpu.vector_store %arg10[%c0_45, %c0_46, %c0_47], %75 {strides = array<i32>} : memref<2x8x32xf32, #tpu.memory_space<vmem>>, vector<2x8x32xf32>,
      %77 = vector.extract_strided_slice %73 {offsets = [0, 32], sizes = [16, 32], strides = [1, 1]} : vector<16x64xf32> to vector<16x32xf32>
      %c0_48 = arith.constant 0 : index
      %c0_49 = arith.constant 0 : index
      %78 = vector.load %arg11[%c0_48, %c0_49] : memref<16x32xf32, #tpu.memory_space<vmem>>, vector<16x32xf32>
      tpu.vector_store %arg11[%c0_48, %c0_49], %77 {strides = array<i32>} : memref<16x32xf32, #tpu.memory_space<vmem>>, vector<16x32xf32>,
      %cst_50 = arith.constant -1.000000e+30 : f32
      %79 = vector.broadcast %cst_50 : f32 to vector<2x8x1xf32>
      %c0_51 = arith.constant 0 : index
      %c0_52 = arith.constant 0 : index
      %c0_53 = arith.constant 0 : index
      %80 = vector.load %arg12[%c0_51, %c0_52, %c0_53] : memref<2x8x1xf32, #tpu.memory_space<vmem>>, vector<2x8x1xf32>
      tpu.vector_store %arg12[%c0_51, %c0_52, %c0_53], %79 {strides = array<i32>} : memref<2x8x1xf32, #tpu.memory_space<vmem>>, vector<2x8x1xf32>,
      %cst_54 = arith.constant 0.000000e+00 : f32
      %81 = vector.broadcast %cst_54 : f32 to vector<2x8x1xf32>
      %c0_55 = arith.constant 0 : index
      %c0_56 = arith.constant 0 : index
      %c0_57 = arith.constant 0 : index
      %82 = vector.load %arg13[%c0_55, %c0_56, %c0_57] : memref<2x8x1xf32, #tpu.memory_space<vmem>>, vector<2x8x1xf32>
      tpu.vector_store %arg13[%c0_55, %c0_56, %c0_57], %81 {strides = array<i32>} : memref<2x8x1xf32, #tpu.memory_space<vmem>>, vector<2x8x1xf32>,
      %cst_58 = arith.constant 0.000000e+00 : f32
      %83 = vector.broadcast %cst_58 : f32 to vector<2x8x32xf32>
      %c0_59 = arith.constant 0 : index
      %c0_60 = arith.constant 0 : index
      %c0_61 = arith.constant 0 : index
      %84 = vector.load %arg14[%c0_59, %c0_60, %c0_61] : memref<2x8x32xf32, #tpu.memory_space<vmem>>, vector<2x8x32xf32>
      tpu.vector_store %arg14[%c0_59, %c0_60, %c0_61], %83 {strides = array<i32>} : memref<2x8x32xf32, #tpu.memory_space<vmem>>, vector<2x8x32xf32>,
    } else {
    }
    %c0 = arith.constant 0 : index
    %c0_1 = arith.constant 0 : index
    %c0_2 = arith.constant 0 : index
    %3 = vector.load %arg4[%c0, %c0_1, %c0_2] : memref<2x8x32xf32, #tpu.memory_space<vmem>>, vector<2x8x32xf32>
    %4 = vector.shape_cast %3 : vector<2x8x32xf32> to vector<16x32xf32>
    %c0_3 = arith.constant 0 : index
    %c0_4 = arith.constant 0 : index
    %5 = vector.load %arg6[%c0_3, %c0_4] : memref<32x32xf32, #tpu.memory_space<vmem>>, vector<32x32xf32>
    %cst = arith.constant dense<0.000000e+00> : vector<16x32xf32>
    %6 = tpu.matmul %4, %5, %cst {dimension_numbers = #tpu.dot_dimension_numbers<[1], [0], [0], [1], [0, 0, 1, 1], [], []>} : vector<16x32xf32>, vector<32x32xf32>, vector<16x32xf32> -> vector<16x32xf32>
    %7 = vector.shape_cast %6 : vector<16x32xf32> to vector<2x8x32xf32>
    %c0_5 = arith.constant 0 : index
    %c0_6 = arith.constant 0 : index
    %c0_7 = arith.constant 0 : index
    %8 = vector.load %arg10[%c0_5, %c0_6, %c0_7] : memref<2x8x32xf32, #tpu.memory_space<vmem>>, vector<2x8x32xf32>
    %9 = vector.shape_cast %8 : vector<2x8x32xf32> to vector<2x8x1x32xf32>
    %10 = vector.shape_cast %7 : vector<2x8x32xf32> to vector<2x1x8x32xf32>
    %11 = vector.broadcast %9 : vector<2x8x1x32xf32> to vector<2x8x8x32xf32>
    %12 = vector.broadcast %10 : vector<2x1x8x32xf32> to vector<2x8x8x32xf32>
    %13 = arith.addf %11, %12 : vector<2x8x8x32xf32>
    %14 = math.tanh %13 : vector<2x8x8x32xf32>
    %c0_8 = arith.constant 0 : index
    %c0_9 = arith.constant 0 : index
    %15 = vector.load %arg7[%c0_8, %c0_9] : memref<1x32xf32, #tpu.memory_space<vmem>>, vector<1x32xf32>
    %16 = vector.shape_cast %15 : vector<1x32xf32> to vector<1x1x1x32xf32>
    %17 = vector.broadcast %16 : vector<1x1x1x32xf32> to vector<2x8x8x32xf32>
    %18 = arith.mulf %14, %17 : vector<2x8x8x32xf32>
    %cst_10 = arith.constant dense<0.000000e+00> : vector<2x8x8xf32>
    %19 = vector.multi_reduction <add>, %18, %cst_10 [3] : vector<2x8x8x32xf32> to vector<2x8x8xf32>
    %c2_i32 = arith.constant 2 : i32
    %20 = arith.muli %arg0, %c2_i32 : i32
    %c8_i32 = arith.constant 8 : i32
    %21 = arith.muli %arg1, %c8_i32 : i32
    %22 = tpu.iota {dimensions = array<i32: 1>} : vector<8x8xi32>
    %23 = vector.broadcast %21 : i32 to vector<8x8xi32>
    %24 = arith.addi %23, %22 : vector<8x8xi32>
    %c0_i32_11 = arith.constant 0 : i32
    %25 = arith.addi %20, %c0_i32_11 : i32
    %26 = arith.index_cast %25 : i32 to index
    %27 = memref.load %arg2[%26] : memref<2xi32, #tpu.memory_space<smem>>
    %28 = vector.broadcast %27 : i32 to vector<8x8xi32>
    %29 = arith.cmpi slt, %24, %28 : vector<8x8xi32>
    %cst_12 = arith.constant 0.000000e+00 : f32
    %cst_13 = arith.constant -1.000000e+30 : f32
    %30 = vector.broadcast %cst_12 : f32 to vector<8x8xf32>
    %31 = vector.broadcast %cst_13 : f32 to vector<8x8xf32>
    %32 = arith.select %29, %30, %31 : vector<8x8xi1>, vector<8x8xf32>
    %c1_i32 = arith.constant 1 : i32
    %33 = arith.addi %20, %c1_i32 : i32
    %34 = arith.index_cast %33 : i32 to index
    %35 = memref.load %arg2[%34] : memref<2xi32, #tpu.memory_space<smem>>
    %36 = vector.broadcast %35 : i32 to vector<8x8xi32>
    %37 = arith.cmpi slt, %24, %36 : vector<8x8xi32>
    %cst_14 = arith.constant 0.000000e+00 : f32
    %cst_15 = arith.constant -1.000000e+30 : f32
    %38 = vector.broadcast %cst_14 : f32 to vector<8x8xf32>
    %39 = vector.broadcast %cst_15 : f32 to vector<8x8xf32>
    %40 = arith.select %37, %38, %39 : vector<8x8xi1>, vector<8x8xf32>
    %41 = vector.shape_cast %32 : vector<8x8xf32> to vector<1x8x8xf32>
    %42 = vector.shape_cast %40 : vector<8x8xf32> to vector<1x8x8xf32>
    %43 = tpu.concatenate %41, %42 in 0 : vector<1x8x8xf32>, vector<1x8x8xf32> -> vector<2x8x8xf32>
    %44 = arith.addf %19, %43 : vector<2x8x8xf32>
    %c0_16 = arith.constant 0 : index
    %c0_17 = arith.constant 0 : index
    %c0_18 = arith.constant 0 : index
    %45 = vector.load %arg12[%c0_16, %c0_17, %c0_18] : memref<2x8x1xf32, #tpu.memory_space<vmem>>, vector<2x8x1xf32>
    %cst_19 = arith.constant dense<0xFF800000> : vector<2x8xf32>
    %46 = vector.multi_reduction <maximumf>, %44, %cst_19 [2] : vector<2x8x8xf32> to vector<2x8xf32>
    %47 = vector.shape_cast %46 : vector<2x8xf32> to vector<2x8x1xf32>
    %48 = arith.maximumf %45, %47 : vector<2x8x1xf32>
    %49 = arith.subf %45, %48 : vector<2x8x1xf32>
    %50 = math.exp %49 : vector<2x8x1xf32>
    %51 = vector.broadcast %48 : vector<2x8x1xf32> to vector<2x8x8xf32>
    %52 = arith.subf %44, %51 : vector<2x8x8xf32>
    %53 = math.exp %52 : vector<2x8x8xf32>
    %c0_20 = arith.constant 0 : index
    %c0_21 = arith.constant 0 : index
    %c0_22 = arith.constant 0 : index
    %54 = vector.load %arg13[%c0_20, %c0_21, %c0_22] : memref<2x8x1xf32, #tpu.memory_space<vmem>>, vector<2x8x1xf32>
    %55 = arith.mulf %50, %54 : vector<2x8x1xf32>
    %cst_23 = arith.constant dense<0.000000e+00> : vector<2x8xf32>
    %56 = vector.multi_reduction <add>, %53, %cst_23 [2] : vector<2x8x8xf32> to vector<2x8xf32>
    %57 = vector.shape_cast %56 : vector<2x8xf32> to vector<2x8x1xf32>
    %58 = arith.addf %55, %57 : vector<2x8x1xf32>
    %c0_24 = arith.constant 0 : index
    %c0_25 = arith.constant 0 : index
    %c0_26 = arith.constant 0 : index
    %59 = vector.load %arg13[%c0_24, %c0_25, %c0_26] : memref<2x8x1xf32, #tpu.memory_space<vmem>>, vector<2x8x1xf32>
    tpu.vector_store %arg13[%c0_24, %c0_25, %c0_26], %58 {strides = array<i32>} : memref<2x8x1xf32, #tpu.memory_space<vmem>>, vector<2x8x1xf32>,
    %c0_27 = arith.constant 0 : index
    %c0_28 = arith.constant 0 : index
    %c0_29 = arith.constant 0 : index
    %60 = vector.load %arg14[%c0_27, %c0_28, %c0_29] : memref<2x8x32xf32, #tpu.memory_space<vmem>>, vector<2x8x32xf32>
    %61 = vector.broadcast %50 : vector<2x8x1xf32> to vector<2x8x32xf32>
    %62 = arith.mulf %61, %60 : vector<2x8x32xf32>
    "tpu.trace_start"() <{level = 10 : i32, message = "bts,bsh->bth"}> : () -> ()
    %cst_30 = arith.constant dense<0.000000e+00> : vector<2x8x32xf32>
    %63 = tpu.matmul %53, %3, %cst_30 {dimension_numbers = #tpu.dot_dimension_numbers<[2], [1], [1], [2], [0, 0, 0, 1, 1, 2], [0], [0]>} : vector<2x8x8xf32>, vector<2x8x32xf32>, vector<2x8x32xf32> -> vector<2x8x32xf32>
    "tpu.trace_stop"() : () -> ()
    %64 = arith.addf %62, %63 : vector<2x8x32xf32>
    %c0_31 = arith.constant 0 : index
    %c0_32 = arith.constant 0 : index
    %c0_33 = arith.constant 0 : index
    %65 = vector.load %arg14[%c0_31, %c0_32, %c0_33] : memref<2x8x32xf32, #tpu.memory_space<vmem>>, vector<2x8x32xf32>
    tpu.vector_store %arg14[%c0_31, %c0_32, %c0_33], %64 {strides = array<i32>} : memref<2x8x32xf32, #tpu.memory_space<vmem>>, vector<2x8x32xf32>,
    %c0_34 = arith.constant 0 : index
    %c0_35 = arith.constant 0 : index
    %c0_36 = arith.constant 0 : index
    %66 = vector.load %arg12[%c0_34, %c0_35, %c0_36] : memref<2x8x1xf32, #tpu.memory_space<vmem>>, vector<2x8x1xf32>
    tpu.vector_store %arg12[%c0_34, %c0_35, %c0_36], %48 {strides = array<i32>} : memref<2x8x1xf32, #tpu.memory_space<vmem>>, vector<2x8x1xf32>,
    %c1_i32_37 = arith.constant 1 : i32
    %67 = arith.cmpi eq, %arg1, %c1_i32_37 : i32
    %68 = arith.extui %67 : i1 to i32
    %c0_i32_38 = arith.constant 0 : i32
    %69 = arith.cmpi ne, %68, %c0_i32_38 : i32
    scf.if %69 {
      %c0_39 = arith.constant 0 : index
      %c0_40 = arith.constant 0 : index
      %c0_41 = arith.constant 0 : index
      %70 = vector.load %arg13[%c0_39, %c0_40, %c0_41] : memref<2x8x1xf32, #tpu.memory_space<vmem>>, vector<2x8x1xf32>
      %71 = tpu.reciprocal %70 {approx = true} : vector<2x8x1xf32> -> vector<2x8x1xf32>
      %c0_42 = arith.constant 0 : index
      %c0_43 = arith.constant 0 : index
      %c0_44 = arith.constant 0 : index
      %72 = vector.load %arg14[%c0_42, %c0_43, %c0_44] : memref<2x8x32xf32, #tpu.memory_space<vmem>>, vector<2x8x32xf32>
      %73 = vector.broadcast %71 : vector<2x8x1xf32> to vector<2x8x32xf32>
      %74 = arith.mulf %72, %73 : vector<2x8x32xf32>
      %75 = vector.shape_cast %74 : vector<2x8x32xf32> to vector<16x32xf32>
      %c0_45 = arith.constant 0 : index
      %c0_46 = arith.constant 0 : index
      %76 = vector.load %arg8[%c0_45, %c0_46] : memref<32x32xf32, #tpu.memory_space<vmem>>, vector<32x32xf32>
      %cst_47 = arith.constant dense<0.000000e+00> : vector<16x32xf32>
      %77 = tpu.matmul %75, %76, %cst_47 {dimension_numbers = #tpu.dot_dimension_numbers<[1], [0], [0], [1], [0, 0, 1, 1], [], []>} : vector<16x32xf32>, vector<32x32xf32>, vector<16x32xf32> -> vector<16x32xf32>
      %c0_48 = arith.constant 0 : index
      %c0_49 = arith.constant 0 : index
      %78 = vector.load %arg11[%c0_48, %c0_49] : memref<16x32xf32, #tpu.memory_space<vmem>>, vector<16x32xf32>
      %79 = arith.addf %77, %78 : vector<16x32xf32>
      %80 = math.tanh %79 : vector<16x32xf32>
      %81 = vector.shape_cast %80 : vector<16x32xf32> to vector<2x8x32xf32>
      %c0_50 = arith.constant 0 : index
      %c0_51 = arith.constant 0 : index
      %c0_52 = arith.constant 0 : index
      %82 = vector.load %arg9[%c0_50, %c0_51, %c0_52] : memref<2x8x32xf32, #tpu.memory_space<vmem>>, vector<2x8x32xf32>
      tpu.vector_store %arg9[%c0_50, %c0_51, %c0_52], %81 {strides = array<i32>} : memref<2x8x32xf32, #tpu.memory_space<vmem>>, vector<2x8x32xf32>,
    } else {
    }
    return
  }
  func.func @transform_0(%arg0: i32, %arg1: i32, %arg2: memref<2xi32, #tpu.memory_space<smem>>) -> (i32, i32, i32) {
    %c0_i32 = arith.constant 0 : i32
    %c0_i32_0 = arith.constant 0 : i32
    %c0_i32_1 = arith.constant 0 : i32
    return %arg0, %c0_i32, %c0_i32_0 : i32, i32, i32
  }
  func.func @transform_1(%arg0: i32, %arg1: i32, %arg2: memref<2xi32, #tpu.memory_space<smem>>) -> (i32, i32, i32) {
    %c0_i32 = arith.constant 0 : i32
    %c0_i32_0 = arith.constant 0 : i32
    return %arg0, %arg1, %c0_i32 : i32, i32, i32
  }
  func.func @transform_2(%arg0: i32, %arg1: i32, %arg2: memref<2xi32, #tpu.memory_space<smem>>) -> (i32, i32) {
    %c0_i32 = arith.constant 0 : i32
    %c0_i32_0 = arith.constant 0 : i32
    %c0_i32_1 = arith.constant 0 : i32
    return %c0_i32, %c0_i32_0 : i32, i32
  }
  func.func @transform_3(%arg0: i32, %arg1: i32, %arg2: memref<2xi32, #tpu.memory_space<smem>>) -> (i32, i32) {
    %c0_i32 = arith.constant 0 : i32
    %c0_i32_0 = arith.constant 0 : i32
    %c0_i32_1 = arith.constant 0 : i32
    return %c0_i32, %c0_i32_0 : i32, i32
  }
  func.func @transform_4(%arg0: i32, %arg1: i32, %arg2: memref<2xi32, #tpu.memory_space<smem>>) -> (i32, i32) {
    %c0_i32 = arith.constant 0 : i32
    %c0_i32_0 = arith.constant 0 : i32
    %c0_i32_1 = arith.constant 0 : i32
    return %c0_i32, %c0_i32_0 : i32, i32
  }
  func.func @transform_5(%arg0: i32, %arg1: i32, %arg2: memref<2xi32, #tpu.memory_space<smem>>) -> (i32, i32) {
    %c0_i32 = arith.constant 0 : i32
    %c0_i32_0 = arith.constant 0 : i32
    %c0_i32_1 = arith.constant 0 : i32
    return %c0_i32, %c0_i32_0 : i32, i32
  }
  func.func @transform_6(%arg0: i32, %arg1: i32, %arg2: memref<2xi32, #tpu.memory_space<smem>>) -> (i32, i32, i32) {
    %c0_i32 = arith.constant 0 : i32
    %c0_i32_0 = arith.constant 0 : i32
    %c0_i32_1 = arith.constant 0 : i32
    return %arg0, %c0_i32, %c0_i32_0 : i32, i32, i32
  }
}

</mosaic_0001>

<bundles_post_ra>
// kernel: tpu_custom_call.1
= control target key start
LH: loop header
LB: loop body
LE: loop exit
PB: predicated region body
PF: predicated region fallthrough
CT: control target
= control target key end

     0   :  { %s2385_s24 = smov [#allocation8]   ;;  %s2944_s0 = inlined_call_operand.hbm [shape: s32[2], index: 0, kind: input, shape index: {}]   ;;  %s2945_s1 = inlined_call_operand.hbm [shape: f32[2,8,32], index: 1, kind: input, shape index: {}]   ;;  %s2946_s2 = inlined_call_operand.hbm [shape: f32[2,16,32], index: 2, kind: input, shape index: {}]   ;;  %s2947_s3 = inlined_call_operand.hbm [shape: f32[32,64], index: 3, kind: input, shape index: {}]   ;;  %s2948_s4 = inlined_call_operand.hbm [shape: f32[32,32], index: 4, kind: input, shape index: {}]   ;;  %s2949_s5 = inlined_call_operand.vmem [shape: f32[1,32], index: 5, kind: input, shape index: {}]   ;;  %s2950_s6 = inlined_call_operand.hbm [shape: f32[32,32], index: 6, kind: input, shape index: {}]   ;;  %s2951_s7 = inlined_call_operand.hbm [shape: f32[2,8,32], index: 7, kind: output, shape index: {}]  }
   0x1   :  { %2955 = sst [smem:[#allocation25_spill]] %s2945_s1 }
   0x2   :  { %13 = dma.hbm_to_smem %s2944_s0, 16, %s2385_s24, [#allocation7] }
   0x3   :  { %2339 = dma.done.wait [#allocation7], 16 }
   0x4   :  { %2340 = vsyncadd [#allocation7], 4294967280 }
   0x5   :  { %15 = sfence }
   0x6   :  { %16 = vsyncpa [#allocation10], 0 }
   0x7   :  { %17 = vsyncpa [#allocation13], 0 }
   0x8   :  { %19 = vsyncpa [#allocation13 + $0x1], 0 }
   0x9   :  { %20 = vsyncpa [#allocation16], 0 }
   0xa   :  { %21 = vsyncpa [#allocation11], 0  ;;  %s2449_s27 = smov 0   ;;  %s2451_s28 = smov 0  }
   0xb   :  { %s2453_s29 = smov 0   ;;  %s2455_s30 = smov 0  }
   0xc   :  { %s2457_s8 = smov 0   ;;  %s2459_s9 = smov 0  }
   0xd LB: > { %s2478_s0 = sadd.s32 4294967295, %s2383_s9   ;;  %p81_p0 = scmp.ne.s32.totalorder %s2371_s29, %s2367_s28  ;;  %s2383_s9 = sphi %s2459_s9, %s27_s9   ;;  %s2379_s8 = sphi %s2457_s8, %s2973_s8   ;;  %s2375_s30 = sphi %s2455_s30, %s2972_s30   ;;  %s2371_s29 = sphi %s2453_s29, %s2971_s29   ;;  %s2367_s28 = sphi %s2451_s28, %s2970_s28   ;;  %s2363_s27 = sphi %s2449_s27, %s2969_s27  }
   0xe   : > { %p82_p1 = scmp.eq.s32.totalorder %s2383_s9, 0  ;;  %p87_p2 = scmp.ne.s32.totalorder %s2367_s28, %s2363_s27 }
   0xf   : > { %p2952_p3 = scmp.eq.s32.totalorder %s2478_s0, 0  ;;  %p1856_p4 = scmp.ge.s32.totalorder %s2383_s9, 1 }
  0x10   : > { %p83_p5 = por %p82_p1, %p81_p0  ;;  %p208_p6 = scmp.lt.s32.totalorder %s2383_s9, 3 }
  0x11   : > { %p2489_p7 = por %p2952_p3, %p87_p2  ;;  %s2386_s12 = smov [#allocation14]  }
  0x12   : > { %p2493_p8 = pnand %p1856_p4, %p208_p6  ;;  %s236_s13 = sshll.u32 %s2386_s12, 4  ;;  %s237_s13 = int_to_ptr.vmem [resolvable:$true] %s236_s13 }
  0x13   : > { %p1995_p11 = scmp.lt.s32.totalorder %s2383_s9, 2  ;;  %s2170_s16 = scalar_lea.vmem %s237_s13, 512 }
  0x14   : > { %p1974_p9 = pneg %p2493_p8  ;;  %p2171_p0 = scmp.ne.s32.totalorder %s237_s13, %s2170_s16 }
  0x15   : > { %p2506_p12 = pnand %p1995_p11, %p83_p5  ;;  %p2178_p4 = scmp.lt.s32.totalorder %s237_s13, %s237_s13 }
  0x16   : > { %p2501_p10 = pnand %p1974_p9, %p2952_p3  ;;  %p2179_p6 = scmp.lt.s32.totalorder %s2170_s16, %s2170_s16 }
  0x18   : > { %p2161_p13 = pneg %p2501_p10  ;;  %p2180_p9 = por %p2179_p6, %p2178_p4 }
  0x1a   : > { %p2173_p1 = pnand %p2171_p0, %p2161_p13 }
  0x1c   : > { %p2174_p2 = pneg %p2173_p1 }
  0x1e   : > { %p2181_p3 = pnand %p2180_p9, %p2174_p2 }
  0x20   : > { %2184 = shalt.err (!%p2181_p3)
}
  0x21   : > { %s2953_s17 = smov 128   ;;  %s2954_s18 = smov 8  }
  0x22   : > { %1980 = dma.hbm_to_vmem [thread:$0]  (!%p2501_p10), %s2947_s3, 512, %s237_s13, [#allocation13], %s2953_s17, %s2953_s17, %s2954_s18  }
  0x23   : > { %s2389_s21 = smov [#allocation15]  }
  0x24   : > { %s249_s22 = sshll.u32 %s2389_s21, 4  ;;  %s250_s22 = int_to_ptr.vmem [resolvable:$true] %s249_s22 }
  0x25   : > { %s2196_s23 = scalar_lea.vmem %s250_s22, 512  ;;  %p2204_p0 = scmp.lt.s32.totalorder %s250_s22, %s250_s22 }
  0x26   : > { %p2197_p5 = scmp.ne.s32.totalorder %s250_s22, %s2196_s23  ;;  %p2205_p1 = scmp.lt.s32.totalorder %s2196_s23, %s2196_s23 }
  0x28   : > { %p2199_p3 = pnand %p2197_p5, %p2161_p13  ;;  %p2206_p2 = por %p2205_p1, %p2204_p0 }
  0x2a   : > { %p2200_p11 = pneg %p2199_p3 }
  0x2c   : > { %p2207_p4 = pnand %p2206_p2, %p2200_p11 }
  0x2e   : > { %2210 = shalt.err (!%p2207_p4)
}
  0x2f   : > { %1983 = dma.hbm_to_vmem [thread:$0]  (!%p2501_p10), %s2948_s4, 512, %s250_s22, [#allocation16], %s2953_s17, %s2953_s17, %s2954_s18  }
  0x30   : > { %s2390_s26 = smov [#allocation9]   ;;  %s2391_s12 = smov [#allocation17]  }
  0x31   : > { %s223_s27 = sshll.u32 %s2390_s26, 4  ;;  %s265_s13 = sshll.u32 %s2391_s12, 4  ;;  %s224_s27 = int_to_ptr.vmem [resolvable:$true] %s223_s27  ;;  %s266_s13 = int_to_ptr.vmem [resolvable:$true] %s265_s13 }
  0x32   : > { %s2222_s16 = scalar_lea.vmem %s224_s27, 256  ;;  %p2230_p3 = scmp.lt.s32.totalorder %s224_s27, %s224_s27 }
  0x33   : > { %p2223_p6 = scmp.ne.s32.totalorder %s224_s27, %s2222_s16  ;;  %p2231_p11 = scmp.lt.s32.totalorder %s2222_s16, %s2222_s16 }
  0x35   : > { %p2225_p9 = pnand %p2223_p6, %p2161_p13  ;;  %p2232_p0 = por %p2231_p11, %p2230_p3 }
  0x37   : > { %p2226_p5 = pneg %p2225_p9 }
  0x39   : > { %p2233_p1 = pnand %p2232_p0, %p2226_p5 }
  0x3b   : > { %2236 = shalt.err (!%p2233_p1)
}
  0x3c   : > { %s2960_s1 = sld [smem:[#allocation25_spill]]  ;;  %s2248_s21 = scalar_lea.vmem %s266_s13, 512 }
  0x3d   : > { %p2249_p2 = scmp.ne.s32.totalorder %s266_s13, %s2248_s21  ;;  %p2256_p9 = scmp.lt.s32.totalorder %s266_s13, %s266_s13 }
  0x3e   : > { %p2257_p3 = scmp.lt.s32.totalorder %s2248_s21, %s2248_s21 }
  0x3f   : > { %p2251_p4 = pnand %p2249_p2, %p2161_p13 }
  0x40   : > { %p2258_p5 = por %p2257_p3, %p2256_p9 }
  0x41   : > { %p2252_p6 = pneg %p2251_p4 }
  0x42   : > { %1977 = dma.hbm_to_vmem [thread:$0]  (!%p2501_p10), %s2960_s1, 256, %s224_s27, [#allocation10], %s2953_s17, %s2953_s17, %s2954_s18  }
  0x43   : > { %p2259_p11 = pnand %p2258_p5, %p2252_p6 }
  0x45   : > { %2262 = shalt.err (!%p2259_p11)
}
  0x46   : > { %1986 = dma.hbm_to_vmem [thread:$0]  (!%p2501_p10), %s2950_s6, 512, %s266_s13, [#allocation16], %s2953_s17, %s2953_s17, %s2954_s18  }
  0x47   : > { %s74_s24 = sadd.s32 1, %s2371_s29  ;;  %s279_s25 = sand.u32 1, %s2383_s9  }
  0x48   : > { %s36_s26 = sadd.s32 1, %s2379_s8  ;;  %s281_s14 = sand.u32 1, %s2371_s29  }
  0x49   : > { %p37_p13 = scmp.ge.s32.totalorder %s36_s26, 2  ;;  %s1862_s27 = sshll.u32 %s281_s14, 4 }
  0x4a   : > { %s1863_s12 = sshll.u32 %s2379_s8, 7  ;;  %s283_s22 = scalar_lea.vmem [#allocation12], %s1862_s27 }
  0x4b   : > { %s2975_s26 = smov (%p37_p13, %s36_s26), 0  ;;  %s291_s20 = scalar_lea.hbm %s2946_s2, %s1863_s12 }
  0x4c   : > { %s70_s21 = ssub.s32 %s2379_s8, %s2975_s26  ;;  %s292_s23 = sshll.u32 %s283_s22, 4  ;;  %s293_s23 = int_to_ptr.vmem [resolvable:$true] %s292_s23 }
  0x4d   : > { %p72_p0 = scmp.eq.s32.totalorder %s70_s21, 0  ;;  %s280_s17 = scalar_lea.sflag [#allocation13], %s279_s25 }
  0x4e   : > { %p2265_p10 = pneg %p2506_p12  ;;  %s2276_s18 = scalar_lea.vmem %s293_s23, 256 }
  0x4f   : > { %s2569_s13 = scalar_select %p72_p0, %s2371_s29, %s74_s24  }
  0x50   : > { %p2277_p1 = scmp.ne.s32.totalorder %s293_s23, %s2276_s18  ;;  %s2392_s14 = smov [#allocation12]  }
  0x51   : > { %s2281_s1 = sshll.u32 %s2392_s14, 4  ;;  %s2282_s1 = int_to_ptr.vmem [resolvable:$false] %s2281_s1 }
  0x52   : > { %p2279_p2 = pnand %p2277_p1, %p2265_p10  ;;  %s2283_s16 = scalar_lea.vmem %s2282_s1, 512 }
  0x53   : > { %p2284_p6 = scmp.lt.s32.totalorder %s293_s23, %s2282_s1  ;;  %p2285_p9 = scmp.lt.s32.totalorder %s2283_s16, %s2276_s18 }
  0x54   : > { %p2280_p4 = pneg %p2279_p2 }
  0x55   : > { %p2286_p3 = por %p2285_p9, %p2284_p6 }
  0x57   : > { %p2287_p5 = pnand %p2286_p3, %p2280_p4 }
  0x59   : > { %2290 = shalt.err (!%p2287_p5)
}
  0x5a   : > { %s2393_s27 = smov 256   ;;  %s2961_s24 = smov 8  }
  0x5b   : > { %s2962_s25 = smov 128   ;;  %304 = sbr.rel (%p2493_p8) target bundleno = 1974 (0x7b6), region = 44 }
  0x5c   : > { %1990 = dma.hbm_to_vmem [thread:$0]  (!%p2506_p12), %s291_s20, 256, %s293_s23, %s280_s17, %s2393_s27, %s2962_s25, %s2961_s24  }
  0x5d   : > { %p2963_p11 = scmp.eq.s32.totalorder (!%p2493_p8), %s2478_s0, 0 }
  0x60   : > { %2342 = dma.done.wait (%p2963_p11), [#allocation10], 256   ;;  %p2964_p13 = pmov %p2963_p11 }
  0x61   : > { %s310_s1 = sand.u32 1, %s2478_s0   ;;  %s312_s18 = sand.u32 1, %s2367_s28  }
  0x62   : > { %2344 = vsyncadd (%p2964_p13), [#allocation10], 4294967040  ;;  %s2585_s12 = sshll.u32 %s312_s18, 4  ;;  %s311_s15 = scalar_lea.sflag [#allocation13], %s310_s1 }
  0x63   : > { %s314_s19 = scalar_lea.vmem [#allocation12], %s2585_s12 }
  0x64   : > { %2346 = dma.done.wait (%p2489_p7), %s311_s15, 256  }
  0x65   : > { %2348 = vsyncadd (%p2489_p7), %s311_s15, 4294967040  ;;  %p2965_p8 = pmov %p2963_p11 }
  0x67   : > { %2350 = dma.done.wait (%p2965_p8), [#allocation13], 512   ;;  %p2966_p12 = pmov %p2965_p8 }
  0x68   : > { %p2967_p0 = pmov %p2965_p8 }
  0x69   : > { %2352 = vsyncadd (%p2966_p12), [#allocation13], 4294966784 }
  0x6a   : > { %2354 = dma.done.wait (%p2967_p0), [#allocation16], 1024   ;;  %p2968_p10 = pmov %p2967_p0 }
  0x6b   : > { %p1870_p1 = scmp.ne.s32.totalorder %s2375_s30, 0 }
  0x6c   : > { %2356 = vsyncadd (%p2968_p10), [#allocation16], 4294966272  ;;  %s2396_s10 = smov (!%p1870_p1), 96  }
  0x6d   : > { %356 = sbr.rel (%p1870_p1) target bundleno = 438 (0x1b6), region = 68 }
  0x72   : > { %v362_v0 = vld [vmem:[#allocation14 + $0x18] sm:$0xff]  ;;  %v361_v1 = vld [vmem:[#allocation14 + $0x10] sm:$0xff]  ;;  %vm363_vm0 = vcmask 261120   ;;  %vm457_vm1 = vcmask 7168   ;;  %v2394_v3 = vmov 0.0   ;;  %v360_v4 = vld [vmem:[#allocation14 + $0x8] sm:$0xff] }
  0x73   : > { %1909 = vmatprep.subr.mxu0 %v362_v0  ;;  %v357_v2 = vld [vmem:[#allocation9] sm:$0xff]  ;;  %460 = vst.msk [vmem:[#allocation5] sm:$0xff] %vm457_vm1, %v2394_v3  ;;  %461 = vst.msk [vmem:[#allocation5 + $0x8] sm:$0xff] %vm457_vm1, %v2394_v3  ;;  %v2395_v5 = vmov -1e+30   ;;  %v359_v6 = vld [vmem:[#allocation14] sm:$0xff] }
  0x74   : > { %462 = vst.msk [vmem:[#allocation6] sm:$0xff] %vm363_vm0, %v2394_v3  ;;  %463 = vst.msk [vmem:[#allocation6 + $0x8] sm:$0xff] %vm363_vm0, %v2394_v3  ;;  %1910 = vmatpush3.msra.mxu0 %v362_v0  ;;  %1917 = vmatprep.mubr.msk.f32.mxu0 %vm363_vm0, %v357_v2  ;;  %v358_v7 = vld [vmem:[#allocation9 + $0x8] sm:$0xff] }
  0x75   : > { %458 = vst.msk [vmem:[#allocation4] sm:$0xff] %vm457_vm1, %v2395_v5  ;;  %459 = vst.msk [vmem:[#allocation4 + $0x8] sm:$0xff] %vm457_vm1, %v2395_v5  ;;  %1911 = vmatprep.subr.mxu0 %v361_v1 }
  0x76   : > { %1912 = vmatpush3.msra.mxu0 %v361_v1 }
  0x77   : > { %1913 = vmatprep.subr.mxu0 %v360_v4 }
  0x78   : > { %1914 = vmatpush3.msra.mxu0 %v360_v4 }
  0x79   : > { %1915 = vmatprep.subr.mxu0 %v359_v6 }
  0x7a   : > { %1916 = vmatpush3.msra.mxu0 %v359_v6 }
  0x7b   : > { %1918 = vmatmul.mubr.msk.f32.vlgmr.msra.gmra.mxu0 %vm363_vm0, %v358_v7 }
 0x13b   : > { %v1919_v8 = vpop.f32.mrf.mxu0 }
 0x13c   : > { %446 = vst.msk [vmem:[#allocation2 + $0x8] sm:$0xff] %vm363_vm0, %v1919_v8 }
 0x13d   : > { %v436_v9 = vpop.f32.mrf.mxu0 }
 0x13e   : > { %445 = vst.msk [vmem:[#allocation2] sm:$0xff] %vm363_vm0, %v436_v9  ;;  %449 = vrot.lane.b32.xlu0 %v436_v9, %s2396_s10 }
 0x142   : > { %451 = vrot.lane.b32.xlu0 %v1919_v8, %s2396_s10 }
 0x1b0   : > { %v450_v10 = vpop.permute.xlu0 %449 }
 0x1b1   : > { %455 = vst.msk [vmem:[#allocation3] sm:$0xff] %vm363_vm0, %v450_v10 }
 0x1b4   : > { %v452_v11 = vpop.permute.xlu0 %451 }
 0x1b5   : > { %456 = vst.msk [vmem:[#allocation3 + $0x8] sm:$0xff] %vm363_vm0, %v452_v11 }
 0x1b6 PF: > { %v469_v12 = vld [vmem:[#allocation15 + $0x18] sm:$0xff]  ;;  %v468_v13 = vld [vmem:[#allocation15 + $0x10] sm:$0xff]  ;;  %vm470_vm2 = vcmask 261120   ;;  %v560_v14 = vlaneseq  ;;  %s1876_s11 = sshll.u32 %s2375_s30, 3  ;;  %s843_s17 = sld [smem:[#allocation8]]  ;;  %v467_v17 = vld [vmem:[#allocation15 + $0x8] sm:$0xff] }
 0x1b7   : > { %1920 = vmatprep.subr.mxu0 %v469_v12  ;;  %v2612_v15 = vld [vmem:[%s314_s19] sm:$0xff]  ;;  %v841_v16 = vstv %s1876_s11  ;;  %s1877_s20 = sld [smem:[#allocation8 + $0x1]]  ;;  %v2620_v23 = vld [vmem:[%s314_s19 + $0x8] sm:$0xff]  ;;  %v2397_v28 = vmov -1e+30   ;;  %vm1128_vm5 = vcmask 1041409  }
 0x1b8   : > { %1921 = vmatpush3.msra.mxu0 %v469_v12  ;;  %1928 = vmatprep.mubr.msk.f32.mxu0 %vm470_vm2, %v2612_v15  ;;  %v561_v18 = vshrl.u32 %v560_v14, 7  ;;  %v840_v19 = vand.u32 127, %v560_v14  ;;  %v466_v20 = vld [vmem:[#allocation15] sm:$0xff]  ;;  %v2398_v51 = vmov 1966171168   ;;  %v553_v55 = vld [vmem:[#allocation2 + $0x8] sm:$0xff] }
 0x1b9   : > { %1922 = vmatprep.subr.mxu0 %v468_v13  ;;  %v558_v52 = vunpack.c.l.s4 %v2398_v51  ;;  %v605_v57 = vcombine.high %v553_v55, %v553_v55  ;;  %v552_v0 = vld [vmem:[#allocation2] sm:$0xff]  ;;  %vm1130_vm6 = vcmask 1042434   ;;  %vm1132_vm7 = vcmask 1043459   ;;  %p1880_p7 = scmp.ne.s32.totalorder %s2375_s30, 1 }
 0x1ba   : > { %1923 = vmatpush3.msra.mxu0 %v468_v13  ;;  %v842_v21 = vadd.s32 %v841_v16, %v840_v19  ;;  %v2616_v22 = vsub.s32 %v840_v19, %v561_v18  ;;  %v2622_v24 = vsub.s32 1, %v561_v18  ;;  %v2624_v26 = vsub.s32 0, %v561_v18 }
 0x1bb   : > { %1924 = vmatprep.subr.mxu0 %v467_v17  ;;  %v2626_v27 = vsub.s32 2, %v561_v18  ;;  %v2630_v30 = vsub.s32 4, %v561_v18  ;;  %v2635_v35 = vsub.s32 3, %v561_v18  ;;  %v2639_v38 = vsub.s32 5, %v561_v18 }
 0x1bc   : > { %1925 = vmatpush3.msra.mxu0 %v467_v17  ;;  %v844_v25 = vstv %s843_s17  ;;  %v2645_v41 = vsub.s32 6, %v561_v18  ;;  %v2649_v44 = vsub.s32 7, %v561_v18  ;;  %v559_v53 = vunpack.c.0.s8 %v558_v52 }
 0x1bd   : > { %1926 = vmatprep.subr.mxu0 %v466_v20  ;;  %vm845_vm3 = vcmp.lt.s32.totalorder %v842_v21, %v844_v25  ;;  %v849_v32 = vstv %s1877_s20  ;;  %v556_v8 = vcombine.high %v552_v0, %v552_v0  ;;  %vm1136_vm8 = vcmask 1045509  }
 0x1be   : > { %1927 = vmatpush3.msra.mxu0 %v466_v20  ;;  %v846_v29 = vsel %vm845_vm3, 0.0, %v2397_v28  ;;  %vm850_vm4 = vcmp.lt.s32.totalorder %v842_v21, %v849_v32  ;;  %v562_v54 = vsub.s32 %v559_v53, %v561_v18  ;;  %vm1134_vm9 = vcmask 1044484  }
 0x1bf   : > { %1929 = vmatmul.mubr.msk.f32.vlgmr.msra.gmra.mxu0 %vm470_vm2, %v2620_v23  ;;  %v864_v31 = vrot.slane %v846_v29, %v2622_v24  ;;  %v857_v33 = vrot.slane %v846_v29, %v2624_v26  ;;  %v871_v34 = vrot.slane %v846_v29, %v2626_v27  ;;  %v885_v36 = vrot.slane %v846_v29, %v2630_v30 }
 0x1c0   : > { %v878_v37 = vrot.slane %v846_v29, %v2635_v35  ;;  %v2641_v39 = vsel %vm850_vm4, 0.0, %v2397_v28  ;;  %v892_v42 = vrot.slane %v846_v29, %v2639_v38  ;;  %v899_v43 = vrot.slane %v846_v29, %v2645_v41 }
 0x1c1   : > { %866 = vbcast.lane.b32.xlu1 %v864_v31, 256  ;;  %859 = vbcast.lane.b32.xlu0 %v857_v33, 256  ;;  %v913_v40 = vrot.slane %v2641_v39, %v2624_v26  ;;  %v920_v45 = vrot.slane %v2641_v39, %v2622_v24  ;;  %v906_v46 = vrot.slane %v846_v29, %v2649_v44  ;;  %vm1138_vm10 = vcmask 1046534  }
 0x1c2   : > { %v927_v47 = vrot.slane %v2641_v39, %v2626_v27  ;;  %v941_v48 = vrot.slane %v2641_v39, %v2630_v30  ;;  %v934_v49 = vrot.slane %v2641_v39, %v2635_v35  ;;  %v948_v50 = vrot.slane %v2641_v39, %v2639_v38 }
 0x1c3   : > { %v612_v56 = vrot.slane %v553_v55, %v562_v54  ;;  %v619_v60 = vrot.slane %v605_v57, %v562_v54  ;;  %v563_v9 = vrot.slane %v552_v0, %v562_v54  ;;  %v570_v18 = vrot.slane %v556_v8, %v562_v54 }
 0x1c4   : > { %vm1140_vm11 = vcmask 1047559   ;;  %vm1151_vm12 = vcmask 64512   ;;  %vm1458_vm13 = vcmask 7168   ;;  %vm2401_vm14 = vmmov 0  }
 0x1c5   : > { %873 = vbcast.lane.b32.xlu1 %v871_v34, 256  ;;  %887 = vbcast.lane.b32.xlu0 %v885_v36, 256  ;;  %v620_v58 = vcombine.high %v612_v56, %v612_v56  ;;  %v628_v59 = vrot.slane %v612_v56, %v562_v54  ;;  %v635_v62 = vrot.slane %v619_v60, %v562_v54  ;;  %v2677_v56 = vld [vmem:[%s2949_s5] ss:$0 sm:$0xff] }
 0x1c6   : > { %v621_v3 = vcombine.high %v619_v60, %v619_v60  ;;  %v571_v19 = vcombine.high %v563_v9, %v563_v9  ;;  %v579_v20 = vrot.slane %v563_v9, %v562_v54  ;;  %v572_v34 = vcombine.high %v570_v18, %v570_v18 }
 0x1c7   : > { %v642_v61 = vrot.slane %v620_v58, %v562_v54  ;;  %v650_v63 = vcombine.high %v628_v59, %v628_v59  ;;  %v689_v5 = vrot.slane %v628_v59, %v2624_v26  ;;  %v651_v6 = vcombine.high %v635_v62, %v635_v62 }
 0x1c8   : > { %v705_v10 = vrot.slane %v635_v62, %v2624_v26  ;;  %v649_v13 = vrot.slane %v621_v3, %v562_v54  ;;  %v657_v31 = vrot.slane %v579_v20, %v2624_v26  ;;  %v593_v36 = vrot.slane %v571_v19, %v562_v54 }
 0x1c9   : > { %880 = vbcast.lane.b32.xlu1 %v878_v37, 256  ;;  %915 = vbcast.lane.b32.xlu0 %v913_v40, 256  ;;  %v693_v1 = vrot.slane %v642_v61, %v2624_v26  ;;  %v652_v2 = vcombine.high %v642_v61, %v642_v61  ;;  %v697_v7 = vrot.slane %v650_v63, %v2624_v26 }
 0x1ca   : > { %v713_v16 = vrot.slane %v651_v6, %v2624_v26  ;;  %v709_v28 = vrot.slane %v649_v13, %v2624_v26  ;;  %v653_v29 = vcombine.high %v649_v13, %v649_v13  ;;  %v601_v37 = vcombine.high %v579_v20, %v579_v20 }
 0x1cb   : > { %v701_v12 = vrot.slane %v652_v2, %v2624_v26 }
 0x1cd   : > { %894 = vbcast.lane.b32.xlu1 %v892_v42, 256  ;;  %901 = vbcast.lane.b32.xlu0 %v899_v43, 256  ;;  %v717_v42 = vrot.slane %v653_v29, %v2624_v26  ;;  %v586_v43 = vrot.slane %v570_v18, %v562_v54 }
 0x1cf   : > { %v602_v51 = vcombine.high %v586_v43, %v586_v43  ;;  %v673_v52 = vrot.slane %v586_v43, %v2624_v26 }
 0x1d1   : > { %922 = vbcast.lane.b32.xlu1 %v920_v45, 256  ;;  %908 = vbcast.lane.b32.xlu0 %v906_v46, 256  ;;  %v661_v45 = vrot.slane %v593_v36, %v2624_v26  ;;  %v681_v59 = vrot.slane %v602_v51, %v2624_v26 }
 0x1d5   : > { %929 = vbcast.lane.b32.xlu1 %v927_v47, 256  ;;  %943 = vbcast.lane.b32.xlu0 %v941_v48, 256  ;;  %v600_v47 = vrot.slane %v572_v34, %v562_v54  ;;  %v603_v48 = vcombine.high %v593_v36, %v593_v36 }
 0x1d7   : > { %v604_v55 = vcombine.high %v600_v47, %v600_v47  ;;  %v669_v57 = vrot.slane %v603_v48, %v2624_v26  ;;  %v677_v0 = vrot.slane %v600_v47, %v2624_v26 }
 0x1d9   : > { %936 = vbcast.lane.b32.xlu1 %v934_v49, 256  ;;  %v665_v49 = vrot.slane %v601_v37, %v2624_v26 }
 0x1dd   : > { %950 = vbcast.lane.b32.xlu1 %v948_v50, 256 }
 0x27f   : > { %v1930_v4 = vpop.f32.mrf.mxu0 }
 0x280   : > { %v743_v11 = vadd.f32 %v1930_v4, %v693_v1  ;;  %v742_v14 = vadd.f32 %v1930_v4, %v689_v5  ;;  %v744_v17 = vadd.f32 %v1930_v4, %v697_v7  ;;  %v746_v21 = vadd.f32 %v1930_v4, %v705_v10 }
 0x281   : > { %v745_v25 = vadd.f32 %v1930_v4, %v701_v12  ;;  %v748_v32 = vadd.f32 %v1930_v4, %v713_v16  ;;  %v543_v33 = vpop.f32.mrf.mxu0  ;;  %v747_v40 = vadd.f32 %v1930_v4, %v709_v28  ;;  %v749_v50 = vadd.f32 %v1930_v4, %v717_v42 }
 0x282   : > { %2074 = vtanh.f32 %v743_v11  ;;  %v734_v46 = vadd.f32 %v657_v31, %v543_v33  ;;  %v735_v53 = vadd.f32 %v661_v45, %v543_v33  ;;  %v736_v58 = vadd.f32 %v665_v49, %v543_v33 }
 0x283   : > { %2076 = vtanh.f32 %v742_v14  ;;  %v738_v60 = vadd.f32 %v673_v52, %v543_v33  ;;  %v685_v1 = vrot.slane %v604_v55, %v2624_v26  ;;  %v737_v4 = vadd.f32 %v669_v57, %v543_v33 }
 0x284   : > { %2078 = vtanh.f32 %v744_v17  ;;  %v740_v8 = vadd.f32 %v681_v59, %v543_v33  ;;  %v739_v12 = vadd.f32 %v677_v0, %v543_v33  ;;  %v2399_v42 = vmov 0  }
 0x285   : > { %2080 = vtanh.f32 %v746_v21  ;;  %v741_v17 = vadd.f32 %v685_v1, %v543_v33  ;;  %2071 = vset.pattern.permute.xlu0 %v2399_v42  ;;  %2070 = vset.pattern.permute.xlu1 %v2399_v42  ;;  %v962_v0 = vrot.slane %v2641_v39, %v2649_v44  ;;  %v955_v1 = vrot.slane %v2641_v39, %v2645_v41 }
 0x286   : > { %2082 = vtanh.f32 %v745_v25 }
 0x287   : > { %2084 = vtanh.f32 %v748_v32 }
 0x288   : > { %2086 = vtanh.f32 %v747_v40 }
 0x289   : > { %2088 = vtanh.f32 %v734_v46 }
 0x28a   : > { %2090 = vtanh.f32 %v749_v50 }
 0x28b   : > { %2092 = vtanh.f32 %v735_v53 }
 0x28c   : > { %2094 = vtanh.f32 %v736_v58 }
 0x28d   : > { %2096 = vtanh.f32 %v738_v60 }
 0x28e   : > { %2098 = vtanh.f32 %v737_v4 }
 0x28f   : > { %v2075_v54 = vpop.eup %2074  ;;  %2100 = vtanh.f32 %v740_v8 }
 0x290   : > { %v2077_v61 = vpop.eup %2076  ;;  %v782_v62 = vmul.f32 %v2075_v54, %v2677_v56  ;;  %2102 = vtanh.f32 %v739_v12 }
 0x291   : > { %v2079_v63 = vpop.eup %2078  ;;  %v781_v2 = vmul.f32 %v2077_v61, %v2677_v56  ;;  %2104 = vtanh.f32 %v741_v17 }
 0x292   : > { %v2081_v3 = vpop.eup %2080  ;;  %v816_v5 = vsel %vm470_vm2, %v782_v62, 0.0  ;;  %v783_v6 = vmul.f32 %v2079_v63, %v2677_v56 }
 0x293   : > { %v2083_v7 = vpop.eup %2082  ;;  %817 = vadd.xlane.f32.xlu1 %v816_v5  ;;  %v813_v9 = vsel %vm470_vm2, %v781_v2, 0.0  ;;  %v785_v10 = vmul.f32 %v2081_v3, %v2677_v56  ;;  %v867_v2 = vpop.permute.xlu1 %866 }
 0x294   : > { %v2085_v11 = vpop.eup %2084  ;;  %814 = vadd.xlane.f32.xlu0 %v813_v9  ;;  %v819_v13 = vsel %vm470_vm2, %v783_v6, 0.0  ;;  %v784_v14 = vmul.f32 %v2083_v7, %v2677_v56  ;;  %v860_v5 = vpop.permute.xlu0 %859 }
 0x295   : > { %v2087_v16 = vpop.eup %2086  ;;  %v825_v18 = vsel %vm470_vm2, %v785_v10, 0.0  ;;  %v787_v19 = vmul.f32 %v2085_v11, %v2677_v56 }
 0x296   : > { %v2089_v20 = vpop.eup %2088  ;;  %v822_v21 = vsel %vm470_vm2, %v784_v14, 0.0  ;;  %v786_v25 = vmul.f32 %v2087_v16, %v2677_v56 }
 0x297   : > { %820 = vadd.xlane.f32.xlu1 %v819_v13  ;;  %v2091_v28 = vpop.eup %2090  ;;  %v831_v29 = vsel %vm470_vm2, %v787_v19, 0.0  ;;  %v773_v31 = vmul.f32 %v2089_v20, %v2677_v56  ;;  %v874_v3 = vpop.permute.xlu1 %873 }
 0x298   : > { %826 = vadd.xlane.f32.xlu0 %v825_v18  ;;  %v2093_v32 = vpop.eup %2092  ;;  %v828_v33 = vsel %vm470_vm2, %v786_v25, 0.0  ;;  %v788_v34 = vmul.f32 %v2091_v28, %v2677_v56  ;;  %v888_v6 = vpop.permute.xlu0 %887 }
 0x299   : > { %v2095_v36 = vpop.eup %2094  ;;  %v789_v37 = vsel %vm470_vm2, %v773_v31, 0.0  ;;  %v774_v40 = vmul.f32 %v2093_v32, %v2677_v56 }
 0x29a   : > { %v2097_v43 = vpop.eup %2096  ;;  %v834_v45 = vsel %vm470_vm2, %v788_v34, 0.0  ;;  %v775_v46 = vmul.f32 %v2095_v36, %v2677_v56 }
 0x29b   : > { %823 = vadd.xlane.f32.xlu1 %v822_v21  ;;  %v2099_v47 = vpop.eup %2098  ;;  %v792_v48 = vsel %vm470_vm2, %v774_v40, 0.0  ;;  %v777_v49 = vmul.f32 %v2097_v43, %v2677_v56  ;;  %v881_v4 = vpop.permute.xlu1 %880 }
 0x29c   : > { %832 = vadd.xlane.f32.xlu0 %v831_v29  ;;  %v2101_v50 = vpop.eup %2100  ;;  %v795_v51 = vsel %vm470_vm2, %v775_v46, 0.0  ;;  %v776_v52 = vmul.f32 %v2099_v47, %v2677_v56  ;;  %v916_v8 = vpop.permute.xlu0 %915 }
 0x29d   : > { %v2103_v53 = vpop.eup %2102  ;;  %v801_v55 = vsel %vm470_vm2, %v777_v49, 0.0  ;;  %v779_v57 = vmul.f32 %v2101_v50, %v2677_v56 }
 0x29e   : > { %v2105_v58 = vpop.eup %2104  ;;  %v798_v54 = vsel %vm470_vm2, %v776_v52, 0.0  ;;  %v778_v59 = vmul.f32 %v2103_v53, %v2677_v56 }
 0x29f   : > { %829 = vadd.xlane.f32.xlu1 %v828_v33  ;;  %v807_v60 = vsel %vm470_vm2, %v779_v57, 0.0  ;;  %v780_v61 = vmul.f32 %v2105_v58, %v2677_v56  ;;  %v895_v56 = vpop.permute.xlu1 %894 }
 0x2a0   : > { %790 = vadd.xlane.f32.xlu0 %v789_v37  ;;  %v804_v62 = vsel %vm470_vm2, %v778_v59, 0.0  ;;  %v902_v10 = vpop.permute.xlu0 %901 }
 0x2a1   : > { %v810_v63 = vsel %vm470_vm2, %v780_v61, 0.0 }
 0x2a3   : > { %835 = vadd.xlane.f32.xlu1 %v834_v45  ;;  %v923_v7 = vpop.permute.xlu1 %922 }
 0x2a4   : > { %793 = vadd.xlane.f32.xlu0 %v792_v48  ;;  %v909_v12 = vpop.permute.xlu0 %908 }
 0x2a7   : > { %796 = vadd.xlane.f32.xlu1 %v795_v51  ;;  %v930_v9 = vpop.permute.xlu1 %929 }
 0x2a8   : > { %802 = vadd.xlane.f32.xlu0 %v801_v55  ;;  %v944_v14 = vpop.permute.xlu0 %943 }
 0x2ab   : > { %799 = vadd.xlane.f32.xlu1 %v798_v54  ;;  %v937_v11 = vpop.permute.xlu1 %936 }
 0x2ac   : > { %808 = vadd.xlane.f32.xlu0 %v807_v60 }
 0x2af   : > { %805 = vadd.xlane.f32.xlu1 %v804_v62  ;;  %v951_v13 = vpop.permute.xlu1 %950 }
 0x2b0   : > { %811 = vadd.xlane.f32.xlu0 %v810_v63 }
 0x2c0   : > { %964 = vbcast.lane.b32.xlu1 %v962_v0, 256 }
 0x2c6   : > { %957 = vbcast.lane.b32.xlu0 %v955_v1, 256 }
 0x31c   : > { %v818_v16 = vpop.xlane.xlu1 %817 }
 0x31d   : > { %v2719_v17 = vadd.f32 %v923_v7, %v818_v16  ;;  %v815_v18 = vpop.xlane.xlu0 %814 }
 0x31e   : > { %v2721_v39 = vadd.f32 %v916_v8, %v815_v18 }
 0x31f   : > { %1044 = vperm.xlu0 %2071, %v2719_v17  }
 0x320   : > { %1041 = vperm.xlu1 %2070, %v2721_v39   ;;  %v821_v19 = vpop.xlane.xlu1 %820 }
 0x321   : > { %v2725_v20 = vadd.f32 %v930_v9, %v821_v19  ;;  %v827_v21 = vpop.xlane.xlu0 %826 }
 0x322   : > { %v2727_v25 = vadd.f32 %v944_v14, %v827_v21 }
 0x323   : > { %1047 = vperm.xlu0 %2071, %v2725_v20  }
 0x324   : > { %1053 = vperm.xlu1 %2070, %v2727_v25   ;;  %v824_v28 = vpop.xlane.xlu1 %823 }
 0x325   : > { %v2731_v29 = vadd.f32 %v937_v11, %v824_v28  ;;  %v833_v31 = vpop.xlane.xlu0 %832 }
 0x327   : > { %1050 = vperm.xlu0 %2071, %v2731_v29  }
 0x328   : > { %v830_v32 = vpop.xlane.xlu1 %829 }
 0x329   : > { %v791_v33 = vpop.xlane.xlu0 %790  ;;  %v2755_v55 = vadd.f32 %v951_v13, %v830_v32 }
 0x32a   : > { %v2734_v34 = vadd.f32 %v860_v5, %v791_v33 }
 0x32c   : > { %1017 = vperm.xlu0 %2071, %v2734_v34   ;;  %v836_v36 = vpop.xlane.xlu1 %835 }
 0x32d   : > { %v794_v37 = vpop.xlane.xlu0 %793 }
 0x32e   : > { %v2737_v40 = vadd.f32 %v867_v2, %v794_v37 }
 0x330   : > { %1020 = vperm.xlu1 %2070, %v2737_v40   ;;  %v797_v42 = vpop.xlane.xlu1 %796 }
 0x331   : > { %v2740_v43 = vadd.f32 %v874_v3, %v797_v42  ;;  %v803_v45 = vpop.xlane.xlu0 %802 }
 0x332   : > { %v2745_v49 = vadd.f32 %v888_v6, %v803_v45 }
 0x334   : > { %1023 = vperm.xlu1 %2070, %v2740_v43   ;;  %v800_v46 = vpop.xlane.xlu1 %799 }
 0x335   : > { %v2743_v47 = vadd.f32 %v881_v4, %v800_v46  ;;  %v809_v48 = vpop.xlane.xlu0 %808 }
 0x336   : > { %v2751_v53 = vadd.f32 %v902_v10, %v809_v48 }
 0x337   : > { %1026 = vperm.xlu0 %2071, %v2743_v47  }
 0x338   : > { %1029 = vperm.xlu1 %2070, %v2745_v49   ;;  %v806_v50 = vpop.xlane.xlu1 %805 }
 0x339   : > { %v2749_v51 = vadd.f32 %v895_v56, %v806_v50  ;;  %v812_v52 = vpop.xlane.xlu0 %811 }
 0x33a   : > { %v2757_v57 = vadd.f32 %v909_v12, %v812_v52 }
 0x33b   : > { %1032 = vperm.xlu0 %2071, %v2749_v51  }
 0x33c   : > { %1035 = vperm.xlu1 %2070, %v2751_v53   ;;  %v965_v58 = vpop.permute.xlu1 %964 }
 0x33d   : > { %v958_v54 = vpop.permute.xlu0 %957  ;;  %v2761_v59 = vadd.f32 %v965_v58, %v836_v36 }
 0x33e   : > { %v2763_v60 = vadd.f32 %v958_v54, %v833_v31 }
 0x33f   : > { %1056 = vperm.xlu0 %2071, %v2755_v55  }
 0x340   : > { %1038 = vperm.xlu1 %2070, %v2757_v57  }
 0x343   : > { %1062 = vperm.xlu0 %2071, %v2761_v59  }
 0x344   : > { %1059 = vperm.xlu1 %2070, %v2763_v60  }
 0x39a   : > { %v1045_v61 = vpop.permute.xlu0 %1044 }
 0x39b   : > { %v1042_v62 = vpop.permute.xlu1 %1041  ;;  %v1103_v18 = vrot.slane %v1045_v61, %v2616_v22 }
 0x39c   : > { %v1099_v16 = vrot.slane %v1042_v62, %v2616_v22 }
 0x39e   : > { %v1048_v63 = vpop.permute.xlu0 %1047  ;;  %v1142_v42 = vsel %vm1128_vm5, %v1103_v18, %v1099_v16 }
 0x39f   : > { %v1054_v0 = vpop.permute.xlu1 %1053  ;;  %v1107_v28 = vrot.slane %v1048_v63, %v2616_v22 }
 0x3a0   : > { %v1115_v54 = vrot.slane %v1054_v0, %v2616_v22 }
 0x3a1   : > { %v1143_v46 = vsel %vm1130_vm6, %v1107_v28, %v1142_v42 }
 0x3a2   : > { %v1051_v1 = vpop.permute.xlu0 %1050 }
 0x3a3   : > { %v1111_v31 = vrot.slane %v1051_v1, %v2616_v22 }
 0x3a5   : > { %v1144_v50 = vsel %vm1132_vm7, %v1111_v31, %v1143_v46 }
 0x3a7   : > { %v1018_v3 = vpop.permute.xlu0 %1017 }
 0x3a8   : > { %v1067_v6 = vrot.slane %v1018_v3, %v2616_v22  ;;  %v1145_v3 = vsel %vm1134_vm9, %v1115_v54, %v1144_v50 }
 0x3ab   : > { %v1021_v2 = vpop.permute.xlu1 %1020 }
 0x3ac   : > { %v1071_v5 = vrot.slane %v1021_v2, %v2616_v22 }
 0x3ae   : > { %v1129_v10 = vsel %vm1128_vm5, %v1071_v5, %v1067_v6 }
 0x3af   : > { %v1024_v4 = vpop.permute.xlu1 %1023 }
 0x3b0   : > { %v1075_v56 = vrot.slane %v1024_v4, %v2616_v22 }
 0x3b2   : > { %v1027_v7 = vpop.permute.xlu0 %1026  ;;  %v1131_v11 = vsel %vm1130_vm6, %v1075_v56, %v1129_v10 }
 0x3b3   : > { %v1030_v8 = vpop.permute.xlu1 %1029  ;;  %v1079_v9 = vrot.slane %v1027_v7, %v2616_v22  ;;  %v2799_v7 = vld [vmem:[#allocation4] sm:$0xff] }
 0x3b4   : > { %v1083_v12 = vrot.slane %v1030_v8, %v2616_v22 }
 0x3b5   : > { %v1133_v13 = vsel %vm1132_vm7, %v1079_v9, %v1131_v11  ;;  %v2809_v11 = vld [vmem:[#allocation4 + $0x8] sm:$0xff] }
 0x3b6   : > { %v1033_v14 = vpop.permute.xlu0 %1032  ;;  %v1135_v33 = vsel %vm1134_vm9, %v1083_v12, %v1133_v13 }
 0x3b7   : > { %v1036_v19 = vpop.permute.xlu1 %1035  ;;  %v1087_v21 = vrot.slane %v1033_v14, %v2616_v22 }
 0x3b8   : > { %v1091_v32 = vrot.slane %v1036_v19, %v2616_v22 }
 0x3b9   : > { %v1137_v36 = vsel %vm1136_vm8, %v1087_v21, %v1135_v33 }
 0x3ba   : > { %v1057_v37 = vpop.permute.xlu0 %1056  ;;  %v1139_v58 = vsel %vm1138_vm10, %v1091_v32, %v1137_v36 }
 0x3bb   : > { %v1039_v45 = vpop.permute.xlu1 %1038  ;;  %v1119_v52 = vrot.slane %v1057_v37, %v2616_v22 }
 0x3bc   : > { %v1095_v48 = vrot.slane %v1039_v45, %v2616_v22 }
 0x3bd   : > { %v1146_v5 = vsel %vm1136_vm8, %v1119_v52, %v1145_v3 }
 0x3be   : > { %v1063_v61 = vpop.permute.xlu0 %1062  ;;  %v1141_v62 = vsel %vm1140_vm11, %v1095_v48, %v1139_v58 }
 0x3bf   : > { %v1060_v63 = vpop.permute.xlu1 %1059  ;;  %v1127_v1 = vrot.slane %v1063_v61, %v2616_v22  ;;  %v1152_v2 = vsel %vm1151_vm12, %v1141_v62, -inf }
 0x3c0   : > { %v1123_v4 = vrot.slane %v1060_v63, %v2616_v22  ;;  %1153 = vmax.xlane.f32.xlu1 %v1152_v2 }
 0x3c2   : > { %v1147_v56 = vsel %vm1138_vm10, %v1123_v4, %v1146_v5 }
 0x3c3   : > { %v1148_v6 = vsel %vm1140_vm11, %v1127_v1, %v1147_v56 }
 0x3c4   : > { %v1155_v0 = vsel %vm1151_vm12, %v1148_v6, -inf }
 0x3c5   : > { %1156 = vmax.xlane.f32.xlu0 %v1155_v0 }
 0x449   : > { %v1154_v8 = vpop.xlane.xlu1 %1153 }
 0x44a   : > { %v2802_v9 = vmax.f32 %v2799_v7, %v1154_v8 }
 0x44c   : > { %v1160_v10 = vsub.f32 %v2799_v7, %v2802_v9  ;;  %1623 = vst.msk [vmem:[#allocation4] sm:$0xff] %vm1458_vm13, %v2802_v9  ;;  %1168 = vperm.xlu0 %2071, %v2802_v9  }
 0x44e   : > { %v1157_v12 = vpop.xlane.xlu0 %1156 }
 0x44f   : > { %v2812_v13 = vmax.f32 %v2809_v11, %v1157_v12 }
 0x451   : > { %v1161_v14 = vsub.f32 %v2809_v11, %v2812_v13  ;;  %1624 = vst.msk [vmem:[#allocation4 + $0x8] sm:$0xff] %vm1458_vm13, %v2812_v13  ;;  %1172 = vperm.xlu1 %2070, %v2812_v13  }
 0x4c7   : > { %v1169_v21 = vpop.permute.xlu0 %1168 }
 0x4c8   : > { %v1177_v36 = vrot.slane %v1169_v21, %v2624_v26  ;;  %v1185_v50 = vrot.slane %v1169_v21, %v2626_v27  ;;  %v1201_v62 = vrot.slane %v1169_v21, %v2645_v41  ;;  %v1197_v63 = vrot.slane %v1169_v21, %v2639_v38 }
 0x4ca   : > { %v1254_v52 = vsub.f32 %v2734_v34, %v1177_v36  ;;  %v1256_v54 = vsub.f32 %v2740_v43, %v1185_v50  ;;  %v1205_v43 = vrot.slane %v1169_v21, %v2649_v44  ;;  %v1259_v3 = vsub.f32 %v2749_v51, %v1197_v63 }
 0x4cc   : > { %v2819_v16 = vpop.permute.xlu1 %1172  ;;  %v1270_v61 = vmul.f32 1.442695, %v1254_v52  ;;  %v1280_v0 = vmul.f32 1.442695, %v1259_v3 }
 0x4cd   : > { %v1209_v18 = vrot.slane %v2819_v16, %v2624_v26  ;;  %v1213_v19 = vrot.slane %v2819_v16, %v2622_v24  ;;  %v1217_v28 = vrot.slane %v2819_v16, %v2626_v27  ;;  %v1225_v31 = vrot.slane %v2819_v16, %v2630_v30 }
 0x4ce   : > { %v1221_v42 = vrot.slane %v2819_v16, %v2635_v35  ;;  %v1237_v51 = vrot.slane %v2819_v16, %v2649_v44 }
 0x4cf   : > { %v1262_v32 = vsub.f32 %v2721_v39, %v1209_v18  ;;  %v1263_v33 = vsub.f32 %v2719_v17, %v1213_v19  ;;  %v1266_v37 = vsub.f32 %v2727_v25, %v1225_v31  ;;  %v1264_v45 = vsub.f32 %v2725_v20, %v1217_v28 }
 0x4d0   : > { %v1181_v39 = vrot.slane %v1169_v21, %v2622_v24  ;;  %v1265_v17 = vsub.f32 %v2731_v29, %v1221_v42  ;;  %v1193_v25 = vrot.slane %v1169_v21, %v2630_v30  ;;  %v1189_v20 = vrot.slane %v1169_v21, %v2635_v35 }
 0x4d1   : > { %v1286_v46 = vmul.f32 1.442695, %v1262_v32  ;;  %v1288_v48 = vmul.f32 1.442695, %v1263_v33  ;;  %v1294_v58 = vmul.f32 1.442695, %v1266_v37  ;;  %v1260_v35 = vsub.f32 %v2751_v53, %v1201_v62 }
 0x4d2   : > { %v1290_v26 = vmul.f32 1.442695, %v1264_v45  ;;  %v1255_v27 = vsub.f32 %v2737_v40, %v1181_v39  ;;  %v1292_v34 = vmul.f32 1.442695, %v1265_v17  ;;  %v1258_v24 = vsub.f32 %v2745_v49, %v1193_v25 }
 0x4d3   : > { %2106 = vpow2.f32 %v1286_v46  ;;  %v1274_v29 = vmul.f32 1.442695, %v1256_v54  ;;  %v1257_v30 = vsub.f32 %v2743_v47, %v1189_v20  ;;  %v1229_v49 = vrot.slane %v2819_v16, %v2639_v38 }
 0x4d4   : > { %2108 = vpow2.f32 %v1288_v48  ;;  %v1272_v1 = vmul.f32 1.442695, %v1255_v27  ;;  %v1278_v40 = vmul.f32 1.442695, %v1258_v24  ;;  %v1261_v47 = vsub.f32 %v2757_v57, %v1205_v43 }
 0x4d5   : > { %2110 = vpow2.f32 %v1294_v58  ;;  %v1276_v4 = vmul.f32 1.442695, %v1257_v30  ;;  %v1282_v56 = vmul.f32 1.442695, %v1260_v35  ;;  %v1233_v53 = vrot.slane %v2819_v16, %v2645_v41 }
 0x4d6   : > { %2112 = vpow2.f32 %v1290_v26  ;;  %v1267_v8 = vsub.f32 %v2755_v55, %v1229_v49  ;;  %v1284_v38 = vmul.f32 1.442695, %v1261_v47  ;;  %v1269_v19 = vsub.f32 %v2761_v59, %v1237_v51 }
 0x4d7   : > { %2114 = vpow2.f32 %v1270_v61  ;;  %v1268_v57 = vsub.f32 %v2763_v60, %v1233_v53  ;;  %v2400_v37 = vmov 0.0  }
 0x4d8   : > { %2116 = vpow2.f32 %v1292_v34  ;;  %v1296_v41 = vmul.f32 1.442695, %v1267_v8  ;;  %v1300_v55 = vmul.f32 1.442695, %v1269_v19  ;;  %1931 = vmatprep.subr.mxu1 %v2400_v37  ;;  %1933 = vmatprep.mubr.msk.f32.mxu1 %vm2401_vm14, %v2400_v37 }
 0x4d9   : > { %2118 = vpow2.f32 %v1274_v29  ;;  %v1298_v28 = vmul.f32 1.442695, %v1268_v57  ;;  %1932 = vmatpush3.msra.mxu1 %v2612_v15  ;;  %v1164_v57 = vmul.f32 1.442695, %v1161_v14 }
 0x4da   : > { %2120 = vpow2.f32 %v1272_v1  ;;  %1936 = vmatprep.subr.mxu1 %v2400_v37 }
 0x4db   : > { %2122 = vpow2.f32 %v1278_v40 }
 0x4dc   : > { %2124 = vpow2.f32 %v1276_v4 }
 0x4dd   : > { %2126 = vpow2.f32 %v1282_v56 }
 0x4de   : > { %2128 = vpow2.f32 %v1280_v0 }
 0x4df   : > { %2130 = vpow2.f32 %v1284_v38 }
 0x4e0   : > { %v2107_v2 = vpop.eup %2106  ;;  %2132 = vpow2.f32 %v1296_v41 }
 0x4e1   : > { %v2109_v5 = vpop.eup %2108  ;;  %1347 = vperm.xlu1 %2070, %v2107_v2   ;;  %2134 = vpow2.f32 %v1298_v28 }
 0x4e2   : > { %1350 = vperm.xlu0 %2071, %v2109_v5   ;;  %v2111_v6 = vpop.eup %2110  ;;  %2136 = vpow2.f32 %v1300_v55 }
 0x4e3   : > { %v2113_v12 = vpop.eup %2112  ;;  %2138 = vpow2.f32 %v1164_v57 }
 0x4e4   : > { %v2115_v18 = vpop.eup %2114 }
 0x4e5   : > { %1359 = vperm.xlu1 %2070, %v2111_v6   ;;  %v2117_v21 = vpop.eup %2116 }
 0x4e6   : > { %1353 = vperm.xlu0 %2071, %v2113_v12   ;;  %v2119_v44 = vpop.eup %2118 }
 0x4e7   : > { %v2121_v16 = vpop.eup %2120 }
 0x4e8   : > { %v2123_v31 = vpop.eup %2122 }
 0x4e9   : > { %1323 = vperm.xlu1 %2070, %v2115_v18   ;;  %v2125_v60 = vpop.eup %2124 }
 0x4ea   : > { %1356 = vperm.xlu0 %2071, %v2117_v21   ;;  %v2127_v32 = vpop.eup %2126 }
 0x4eb   : > { %v2129_v59 = vpop.eup %2128 }
 0x4ec   : > { %v2131_v33 = vpop.eup %2130 }
 0x4ed   : > { %1329 = vperm.xlu1 %2070, %v2119_v44   ;;  %v2133_v36 = vpop.eup %2132 }
 0x4ee   : > { %1326 = vperm.xlu0 %2071, %v2121_v16   ;;  %v2135_v42 = vpop.eup %2134 }
 0x4ef   : > { %v2137_v45 = vpop.eup %2136 }
 0x4f0   : > { %v2139_v16 = vpop.eup %2138 }
 0x4f1   : > { %1335 = vperm.xlu1 %2070, %v2123_v31   ;;  %v1302_v31 = vld [vmem:[#allocation5] sm:$0xff] }
 0x4f2   : > { %1332 = vperm.xlu0 %2071, %v2125_v60  }
 0x4f5   : > { %1341 = vperm.xlu1 %2070, %v2127_v32  }
 0x4f6   : > { %1338 = vperm.xlu0 %2071, %v2129_v59  }
 0x4f9   : > { %1344 = vperm.xlu1 %2070, %v2131_v33   ;;  %v1303_v33 = vld [vmem:[#allocation5 + $0x8] sm:$0xff] }
 0x4fa   : > { %1362 = vperm.xlu0 %2071, %v2133_v36   ;;  %v1305_v36 = vmul.f32 %v2139_v16, %v1303_v33 }
 0x4fd   : > { %1365 = vperm.xlu1 %2070, %v2135_v42  }
 0x4fe   : > { %1368 = vperm.xlu0 %2071, %v2137_v45   ;;  %v1461_v45 = vld [vmem:[#allocation6] sm:$0xff] }
 0x55c   : > { %v1348_v46 = vpop.permute.xlu1 %1347 }
 0x55d   : > { %v1351_v48 = vpop.permute.xlu0 %1350  ;;  %v1405_v29 = vrot.slane %v1348_v46, %v2616_v22  ;;  %v1462_v46 = vld [vmem:[#allocation6 + $0x8] sm:$0xff] }
 0x55e   : > { %v1409_v63 = vrot.slane %v1351_v48, %v2616_v22 }
 0x560   : > { %v1360_v50 = vpop.permute.xlu1 %1359  ;;  %v1441_v49 = vsel %vm1128_vm5, %v1409_v63, %v1405_v29 }
 0x561   : > { %v1354_v52 = vpop.permute.xlu0 %1353  ;;  %v1421_v12 = vrot.slane %v1360_v50, %v2616_v22 }
 0x562   : > { %v1413_v43 = vrot.slane %v1354_v52, %v2616_v22 }
 0x564   : > { %v1324_v58 = vpop.permute.xlu1 %1323  ;;  %v1442_v56 = vsel %vm1130_vm6, %v1413_v43, %v1441_v49 }
 0x565   : > { %v1357_v39 = vpop.permute.xlu0 %1356  ;;  %v1373_v25 = vrot.slane %v1324_v58, %v2616_v22 }
 0x566   : > { %v1417_v40 = vrot.slane %v1357_v39, %v2616_v22 }
 0x568   : > { %v1330_v17 = vpop.permute.xlu1 %1329  ;;  %v1443_v0 = vsel %vm1132_vm7, %v1417_v40, %v1442_v56 }
 0x569   : > { %v1327_v26 = vpop.permute.xlu0 %1326  ;;  %v1381_v54 = vrot.slane %v1330_v17, %v2616_v22  ;;  %v1444_v41 = vsel %vm1134_vm9, %v1421_v12, %v1443_v0 }
 0x56a   : > { %v1377_v15 = vrot.slane %v1327_v26, %v2616_v22 }
 0x56c   : > { %v1434_v61 = vsel %vm1128_vm5, %v1377_v15, %v1373_v25  ;;  %v1336_v20 = vpop.permute.xlu1 %1335 }
 0x56d   : > { %v1333_v27 = vpop.permute.xlu0 %1332  ;;  %v1389_v62 = vrot.slane %v1336_v20, %v2616_v22  ;;  %v1435_v24 = vsel %vm1130_vm6, %v1381_v54, %v1434_v61 }
 0x56e   : > { %v1385_v34 = vrot.slane %v1333_v27, %v2616_v22 }
 0x570   : > { %v1436_v30 = vsel %vm1132_vm7, %v1385_v34, %v1435_v24  ;;  %v1342_v1 = vpop.permute.xlu1 %1341 }
 0x571   : > { %v1339_v35 = vpop.permute.xlu0 %1338  ;;  %v1397_v2 = vrot.slane %v1342_v1, %v2616_v22  ;;  %v1437_v4 = vsel %vm1134_vm9, %v1389_v62, %v1436_v30 }
 0x572   : > { %v1393_v3 = vrot.slane %v1339_v35, %v2616_v22 }
 0x574   : > { %v1438_v5 = vsel %vm1136_vm8, %v1393_v3, %v1437_v4  ;;  %v1345_v47 = vpop.permute.xlu1 %1344 }
 0x575   : > { %v1401_v53 = vrot.slane %v1345_v47, %v2616_v22  ;;  %v1363_v6 = vpop.permute.xlu0 %1362  ;;  %v1439_v8 = vsel %vm1138_vm10, %v1397_v2, %v1438_v5 }
 0x576   : > { %v1425_v51 = vrot.slane %v1363_v6, %v2616_v22 }
 0x577   : > { %v1440_v38 = vsel %vm1140_vm11, %v1401_v53, %v1439_v8 }
 0x578   : > { %v1366_v18 = vpop.permute.xlu1 %1365  ;;  %1934 = vmatmul.mubr.msk.f32.vlgmr.msra.gmra.mxu1 %vm1151_vm12, %v1440_v38  ;;  %v1450_v19 = vsel %vm1151_vm12, %v1440_v38, 0.0  ;;  %v1445_v44 = vsel %vm1136_vm8, %v1425_v51, %v1444_v41 }
 0x579   : > { %v1429_v21 = vrot.slane %v1366_v18, %v2616_v22  ;;  %v1369_v28 = vpop.permute.xlu0 %1368  ;;  %1937 = vmatpush3.msra.mxu1 %v2620_v23  ;;  %1451 = vadd.xlane.f32.xlu1 %v1450_v19  ;;  %v1162_v23 = vmul.f32 1.442695, %v1160_v10 }
 0x57a   : > { %v1433_v55 = vrot.slane %v1369_v28, %v2616_v22  ;;  %1938 = vmatprep.mubr.msk.f32.mxu1 %vm2401_vm14, %v2400_v37 }
 0x57b   : > { %v1446_v11 = vsel %vm1138_vm10, %v1429_v21, %v1445_v44  ;;  %2140 = vpow2.f32 %v1162_v23 }
 0x57c   : > { %v1447_v13 = vsel %vm1140_vm11, %v1433_v55, %v1446_v11 }
 0x57d   : > { %1939 = vmatmul.mubr.msk.f32.vlgmr.msra.gmra.mxu1 %vm1151_vm12, %v1447_v13  ;;  %v1453_v14 = vsel %vm1151_vm12, %v1447_v13, 0.0 }
 0x57e   : > { %1454 = vadd.xlane.f32.xlu0 %v1453_v14 }
 0x588   : > { %v2141_v22 = vpop.eup %2140 }
 0x589   : > { %v1304_v60 = vmul.f32 %v2141_v22, %v1302_v31 }
 0x58a   : > { %1470 = vperm.xlu1 %2070, %v2139_v16  }
 0x594   : > { %1465 = vperm.xlu0 %2071, %v2141_v22  }
 0x602   : > { %v1452_v32 = vpop.xlane.xlu1 %1451 }
 0x603   : > { %v1456_v59 = vadd.f32 %v1452_v32, %v1304_v60 }
 0x605   : > { %1459 = vst.msk [vmem:[#allocation5] sm:$0xff] %vm1458_vm13, %v1456_v59 }
 0x606   : > { %v1471_v48 = vpop.permute.xlu1 %1470 }
 0x607   : > { %v1455_v37 = vpop.xlane.xlu0 %1454  ;;  %v1474_v58 = vmul.f32 %v1471_v48, %v1462_v46 }
 0x608   : > { %v1457_v42 = vadd.f32 %v1455_v37, %v1305_v36 }
 0x60a   : > { %1460 = vst.msk [vmem:[#allocation5 + $0x8] sm:$0xff] %vm1458_vm13, %v1457_v42 }
 0x60f   : > { %v1466_v7 = vpop.permute.xlu0 %1465 }
 0x610   : > { %v1473_v9 = vmul.f32 %v1466_v7, %v1461_v45 }
 0x638   : > { %v1543_v10 = vpop.f32.mrf.mxu1 }
 0x639   : > { %v1619_v50 = vadd.f32 %v1543_v10, %v1473_v9 }
 0x63a   : > { %v1935_v52 = vpop.f32.mrf.mxu1 }
 0x63b   : > { %1621 = vst.msk [vmem:[#allocation6] sm:$0xff] %vm470_vm2, %v1619_v50 }
 0x63c   : > { %1628 = sbr.rel (%p1880_p7) target bundleno = 1958 (0x7a6), region = 72 }
 0x63d   : > { %v1615_v39 = vpop.f32.mrf.mxu1 }
 0x63e   : > { %v1620_v17 = vadd.f32 %v1615_v39, %v1474_v58 }
 0x63f   : > { %v1940_v26 = vpop.f32.mrf.mxu1 }
 0x640   : > { %1622 = vst.msk [vmem:[#allocation6 + $0x8] sm:$0xff] %vm470_vm2, %v1620_v17 }
 0x641   : > { %v1629_v25 = vld [vmem:[#allocation5] sm:$0xff]  ;;  %v1630_v15 = vld [vmem:[#allocation5 + $0x8] sm:$0xff]  ;;  %v2402_v61 = vmov 0   ;;  %v1648_v27 = vld [vmem:[#allocation17 + $0x8] sm:$0xff] }
 0x642   : > { %v1650_v54 = vld [vmem:[#allocation17 + $0x18] sm:$0xff]  ;;  %2142 = vset.pattern.permute.xlu0 %v2402_v61  ;;  %2143 = vrcp.f32 %v1629_v25  ;;  %v1649_v20 = vld [vmem:[#allocation17 + $0x10] sm:$0xff]  ;;  %v1647_v62 = vld [vmem:[#allocation17] sm:$0xff] }
 0x643   : > { %1941 = vmatprep.subr.mxu0 %v1650_v54  ;;  %2145 = vrcp.f32 %v1630_v15  ;;  %v1633_v29 = vld [vmem:[#allocation6] sm:$0xff]  ;;  %v1652_v40 = vld [vmem:[#allocation3 + $0x8] sm:$0xff]  ;;  %v1651_v3 = vld [vmem:[#allocation3] sm:$0xff] }
 0x644   : > { %1942 = vmatpush3.msra.mxu0 %v1650_v54 }
 0x645   : > { %1943 = vmatprep.subr.mxu0 %v1649_v20 }
 0x646   : > { %1944 = vmatpush3.msra.mxu0 %v1649_v20 }
 0x647   : > { %1945 = vmatprep.subr.mxu0 %v1648_v27  ;;  %v1634_v1 = vld [vmem:[#allocation6 + $0x8] sm:$0xff] }
 0x648   : > { %1946 = vmatpush3.msra.mxu0 %v1648_v27 }
 0x649   : > { %1947 = vmatprep.subr.mxu0 %v1647_v62 }
 0x64a   : > { %1948 = vmatpush3.msra.mxu0 %v1647_v62 }
 0x64f   : > { %v2144_v34 = vpop.eup %2143 }
 0x650   : > { %1637 = vperm.xlu0 %2142, %v2144_v34   ;;  %v2146_v24 = vpop.eup %2145 }
 0x654   : > { %1642 = vperm.xlu0 %2142, %v2146_v24  }
 0x6cb   : > { %v1638_v63 = vpop.permute.xlu0 %1637 }
 0x6cc   : > { %v1645_v30 = vmul.f32 %v1638_v63, %v1633_v29 }
 0x6ce   : > { %1949 = vmatprep.mubr.msk.f32.mxu0 %vm470_vm2, %v1645_v30 }
 0x6cf   : > { %v1643_v43 = vpop.permute.xlu0 %1642 }
 0x6d0   : > { %v1646_v35 = vmul.f32 %v1643_v43, %v1634_v1 }
 0x6d2   : > { %1950 = vmatmul.mubr.msk.f32.vlgmr.msra.gmra.mxu0 %vm470_vm2, %v1646_v35 }
 0x792   : > { %v1951_v2 = vpop.f32.mrf.mxu0 }
 0x793   : > { %v1731_v4 = vadd.f32 %v1951_v2, %v1652_v40 }
 0x794   : > { %v1725_v49 = vpop.f32.mrf.mxu0 }
 0x795   : > { %2147 = vtanh.f32 %v1731_v4  ;;  %v1726_v5 = vadd.f32 %v1725_v49, %v1651_v3 }
 0x797   : > { %2149 = vtanh.f32 %v1726_v5 }
 0x7a2   : > { %v2148_v47 = vpop.eup %2147 }
 0x7a3   : > { %1737 = vst.msk [vmem:[#allocation18 + $0x8] sm:$0xff] %vm470_vm2, %v2148_v47 }
 0x7a4   : > { %v2150_v56 = vpop.eup %2149 }
 0x7a5   : > { %1736 = vst.msk [vmem:[#allocation18] sm:$0xff] %vm470_vm2, %v2150_v56 }
 0x7a6 PF: > { %p2000_p2 = scmp.eq.s32.totalorder %s2478_s0, 1  ;;  %s2403_s30 = smov [#allocation18]  }
 0x7a7   : > { %s1747_s23 = sshll.u32 %s2403_s30, 4  ;;  %s1748_s23 = int_to_ptr.vmem [resolvable:$true] %s1747_s23 }
 0x7a8   : > { %s2291_s14 = scalar_lea.vmem %s1748_s23, 256  ;;  %p2298_p3 = scmp.lt.s32.totalorder %s1748_s23, %s1748_s23 }
 0x7a9   : > { %p2292_p4 = scmp.ne.s32.totalorder %s1748_s23, %s2291_s14  ;;  %p2299_p5 = scmp.lt.s32.totalorder %s2291_s14, %s2291_s14 }
 0x7ab   : > { %p2293_p6 = pnand %p2292_p4, %p2000_p2  ;;  %p2300_p11 = por %p2299_p5, %p2298_p3 }
 0x7ad   : > { %p2294_p9 = pneg %p2293_p6 }
 0x7af   : > { %p2301_p13 = pnand %p2300_p11, %p2294_p9 }
 0x7b1   : > { %2304 = shalt.err (!%p2301_p13)
}
 0x7b2   : > { %s2404_s16 = smov 128   ;;  %s2405_s27 = smov 8  }
 0x7b3   : > { %1971 = dma.vmem_to_hbm [thread:$0]  (%p2000_p2), %s1748_s23, 256, %s2951_s7, [#allocation11], %s2404_s16, %s2404_s16, %s2405_s27  }
 0x7b4   : > { %2358 = dma.done.wait (%p2000_p2), [#allocation11], 256  }
 0x7b5   : > { %2360 = vsyncadd (%p2000_p2), [#allocation11], 4294967040 }
 0x7b6 PF: > { %s27_s9 = sadd.s32 1, %s2383_s9   ;;  %s2969_s27 = smov %s2367_s28 }
 0x7b7   : > { %p24_p8 = scmp.ge.s32.totalorder %s27_s9, 4   ;;  %s2970_s28 = smov %s2371_s29 }
 0x7b8   : > { %s2971_s29 = smov %s2569_s13  ;;  %s2972_s30 = smov %s2379_s8 }
 0x7b9   : > { %s2973_s8 = smov %s2975_s26  ;;  %26 = sbr.rel (!%p24_p8) target bundleno = 13 (0xd), region = 108 }
 0x7be   :  { %1763 = vsyncpa [#allocation10], 1 }
 0x7bf   :  { %1765 = vsyncpa [#allocation10 + $0x1], 1 }
 0x7c0   :  { %1766 = vsyncpa [#allocation13], 1 }
 0x7c1   :  { %1768 = vsyncpa [#allocation13 + $0x1], 1 }
 0x7c2   :  { %1769 = vsyncpa [#allocation16], 1 }
 0x7c3   :  { %1770 = vsyncpa [#allocation11], 1 }
 0x7c4   :  { %1772 = vsyncpa [#allocation11 + $0x1], 1 }

</bundles_post_ra>
